<compile_context>
chip_gen: v6e
topology: v6e:2x2x1
jax: 0.10.0
libtpu: 0.0.40
codegen_flags: <defaults>
</compile_context>

<pallas_src>
import functools

import jax
import jax.numpy as jnp
import numpy as np
from jax import lax
from jax.experimental import pallas as pl
from jax.experimental.pallas import tpu as pltpu


# ---------------------------------------------------------------------------
# Pallas kernel: one grid step processes `batch_block` batch elements end-to-end,
# with the batch folded into the row dimension for every dense op.
# ---------------------------------------------------------------------------
def _decoder_block_kernel(
    x_ref,                        # (bb*T, E)        f32
    ln1w_ref, ln1b_ref,           # (1, E)           f32
    wqkv_ref,                     # (E, 3*NH*hs)     bf16  [Q(scaled) | K | V], head-major cols
    wproj_ref,                    # (NH*hs, E)       bf16  fused output projection
    projb_ref,                    # (1, E)           f32
    ln2w_ref, ln2b_ref,           # (1, E)           f32
    w1_ref,                       # (E, H)           bf16
    b1_ref,                       # (1, H)           f32
    w2_ref,                       # (H, E)           bf16
    b2_ref,                       # (1, E)           f32
    y_ref,                        # (bb*T, E)        f32
    attn_ref,                     # (bb, NH, T, T)   f32
    hcat_ref,                     # scratch (bb*T, NH*hs) bf16 — concatenated head outputs
    *, num_heads, head_size, seq_len, batch_block, eps, use_alibi,
):
    NH, hs, T, bb = num_heads, head_size, seq_len, batch_block
    x = x_ref[...]                                   # (bb*T, E) f32
    R, E = x.shape

    # ---- LayerNorm 1 over all bb*T rows at once (f32 elementwise) ----
    mean = jnp.mean(x, axis=-1, keepdims=True)
    var = jnp.mean((x - mean) ** 2, axis=-1, keepdims=True)
    xn = (x - mean) * lax.rsqrt(var + eps) * ln1w_ref[0] + ln1b_ref[0]

    # ---- Fused QKV projection: one wide bf16 MXU matmul, f32 accumulate ----
    # (attention scale E**-0.5 is already folded into the Q columns of wqkv)
    qkv = jnp.dot(xn.astype(jnp.bfloat16), wqkv_ref[...],
                  preferred_element_type=jnp.float32)          # (bb*T, 3*NH*hs)

    # ---- Stack per-(batch, head) slices into batched (bb*NH, T, hs) operands ----
    qo, ko, vo = 0, NH * hs, 2 * NH * hs

    def gather(off):
        slabs = [qkv[b * T:(b + 1) * T, off + h * hs: off + (h + 1) * hs]
                 for b in range(bb) for h in range(NH)]
        return jnp.stack(slabs, axis=0).astype(jnp.bfloat16)   # (bb*NH, T, hs)

    q = gather(qo)
    k = gather(ko)
    v = gather(vo)

    # ---- Batched masked attention (one score matmul, one softmax epilogue) ----
    scores = jnp.einsum("gtd,gsd->gts", q, k,
                        preferred_element_type=jnp.float32)    # (bb*NH, T, T) f32

    row = lax.broadcasted_iota(jnp.int32, (T, T), 0)
    col = lax.broadcasted_iota(jnp.int32, (T, T), 1)
    causal = col <= row
    if use_alibi:
        # ALiBi bias, pre-scaled by E**-0.5 (scale already folded into Q).
        bias = jnp.where(causal, (col - row).astype(jnp.float32) * (float(E) ** -0.5),
                         jnp.float32(0.0))
        scores = scores + bias[None, :, :]
    scores = jnp.where(causal[None, :, :], scores, jnp.float32(-1e30))
    scores = scores - jnp.max(scores, axis=-1, keepdims=True)
    p = jnp.exp(scores)
    att = p / jnp.sum(p, axis=-1, keepdims=True)   # exact: attention maps are returned

    # TODO(synk): for realistic T the attention-map output should be lane-dense
    # (flat (B, NH*T*T) slab) or optional; at T=8 every layout under-fills the
    # 128-lane vreg, so we keep the module's (B, NH, T, T) layout.
    attn_ref[...] = att.reshape(bb, NH, T, T)

    head_out = jnp.einsum("gts,gsd->gtd", att.astype(jnp.bfloat16), v,
                          preferred_element_type=jnp.float32)  # (bb*NH, T, hs) f32
    ho_bf = head_out.astype(jnp.bfloat16)

    # "Concatenate heads" via lane-slice stores into the bf16 scratch.
    for b in range(bb):
        for h in range(NH):
            hcat_ref[b * T:(b + 1) * T, h * hs:(h + 1) * hs] = ho_bf[b * NH + h]

    # ---- Fused output projection on concatenated heads (single matmul) ----
    proj = jnp.dot(hcat_ref[...], wproj_ref[...],
                   preferred_element_type=jnp.float32) + projb_ref[0]
    # nn.Dropout(0.1) after the projection is identity here (eval mode).

    x1 = x + proj                                    # residual 1

    # ---- LayerNorm 2 ----
    mean2 = jnp.mean(x1, axis=-1, keepdims=True)
    var2 = jnp.mean((x1 - mean2) ** 2, axis=-1, keepdims=True)
    xn2 = (x1 - mean2) * lax.rsqrt(var2 + eps) * ln2w_ref[0] + ln2b_ref[0]

    # ---- Feed-forward: Linear -> ReLU -> Linear (-> Dropout = identity) ----
    # TODO(synk): for realistic E/H, K-tile these matmuls and single-buffer the
    # constant-weight inputs (pipeline_mode=pl.Buffered(1), explicit vmem_limit_bytes)
    # to respect v7x's 64 MiB VMEM; unnecessary at these toy sizes.
    h1 = jnp.dot(xn2.astype(jnp.bfloat16), w1_ref[...],
                 preferred_element_type=jnp.float32) + b1_ref[0]
    h1 = jnp.maximum(h1, 0.0)
    ff = jnp.dot(h1.astype(jnp.bfloat16), w2_ref[...],
                 preferred_element_type=jnp.float32) + b2_ref[0]

    y_ref[...] = x1 + ff                             # residual 2


# ---------------------------------------------------------------------------
# Wrapper
# ---------------------------------------------------------------------------
def decoder_block(x, params, *, num_heads, head_size, eps=1e-5,
                  embedding_strategy="alibi"):
    B, T, E = x.shape
    H = params["w1"].shape[1]
    NH, hs = num_heads, head_size
    scale = float(E) ** -0.5

    # Host-side weight prep: fold the attention scale into Q, fuse per-head weights,
    # cast MXU operands to bf16 (one-time cost, not per-call input scaling).
    wqkv = jnp.concatenate(
        [(params["wq"] * scale).transpose(1, 0, 2).reshape(E, NH * hs),
         params["wk"].transpose(1, 0, 2).reshape(E, NH * hs),
         params["wv"].transpose(1, 0, 2).reshape(E, NH * hs)],
        axis=-1).astype(jnp.bfloat16)                              # (E, 3*NH*hs)
    wproj = params["proj_w"].reshape(NH * hs, E).astype(jnp.bfloat16)
    w1 = params["w1"].astype(jnp.bfloat16)
    w2 = params["w2"].astype(jnp.bfloat16)

    # Grid: fold the whole batch into one step at small B (kills per-step overhead,
    # doubles MXU row fill); keep a 2-way "parallel" split when B >= 4 so both
    # v7x TensorCores get work.
    nb = 2 if (B >= 4 and B % 2 == 0) else 1
    bb = B // nb
    x2 = x.reshape(B * T, E)

    kernel = functools.partial(
        _decoder_block_kernel, num_heads=NH, head_size=hs, seq_len=T,
        batch_block=bb, eps=eps, use_alibi=(embedding_strategy == "alibi"))

    const = lambda shape: pl.BlockSpec(shape, lambda i, _s=shape: (0,) * len(_s))

    in_specs = [
        pl.BlockSpec((bb * T, E), lambda i: (i, 0)),         # x (batch folded into rows)
        const((1, E)), const((1, E)),                        # ln1 w,b
        const((E, 3 * NH * hs)),                             # fused QKV weight (bf16)
        const((NH * hs, E)),                                 # fused proj weight (bf16)
        const((1, E)),                                       # proj bias
        const((1, E)), const((1, E)),                        # ln2 w,b
        const((E, H)), const((1, H)),                        # ff1 w,b
        const((H, E)), const((1, E)),                        # ff2 w,b
    ]
    out_specs = [
        pl.BlockSpec((bb * T, E), lambda i: (i, 0)),
        pl.BlockSpec((bb, NH, T, T), lambda i: (i, 0, 0, 0)),
    ]
    out_shape = [
        jax.ShapeDtypeStruct((B * T, E), jnp.float32),
        jax.ShapeDtypeStruct((B, NH, T, T), jnp.float32),
    ]

    y2, attn = pl.pallas_call(
        kernel,
        grid=(nb,),
        in_specs=in_specs,
        out_specs=out_specs,
        out_shape=out_shape,
        scratch_shapes=[pltpu.VMEM((bb * T, NH * hs), jnp.bfloat16)],
        compiler_params=pltpu.CompilerParams(
            dimension_semantics=("parallel",)),
    )(
        x2,
        params["ln1_w"], params["ln1_b"],
        wqkv, wproj, params["proj_b"],
        params["ln2_w"], params["ln2_b"],
        w1, params["b1"], w2, params["b2"],
    )
    return y2.reshape(B, T, E), attn


# ---------------------------------------------------------------------------
# Pure-JAX reference (mirrors the PyTorch forward in f32, eval mode)
# ---------------------------------------------------------------------------
def get_alibi_matrix(T):
    r = jnp.arange(T)[:, None]
    c = jnp.arange(T)[None, :]
    return jnp.where(c <= r, c - r, 0).astype(jnp.float32)


def decoder_block_ref(x, p, *, num_heads, head_size, eps=1e-5,
                      embedding_strategy="alibi"):
    B, T, E = x.shape

    def ln(v, w, b):
        m = jnp.mean(v, -1, keepdims=True)
        s = jnp.mean((v - m) ** 2, -1, keepdims=True)
        return (v - m) * lax.rsqrt(s + eps) * w[0] + b[0]

    alibi = (get_alibi_matrix(T) if embedding_strategy == "alibi"
             else jnp.zeros((T, T), jnp.float32))
    xn = ln(x, p["ln1_w"], p["ln1_b"])
    causal = jnp.tril(jnp.ones((T, T), bool))
    scale = jnp.float32(E) ** -0.5

    proj = jnp.zeros_like(x)
    attn_maps = []
    for h in range(num_heads):
        q = xn @ p["wq"][h]
        k = xn @ p["wk"][h]
        v = xn @ p["wv"][h]
        s = (jnp.einsum("btd,bsd->bts", q, k) + alibi) * scale
        s = jnp.where(causal, s, jnp.float32(-1e30))
        s = s - jnp.max(s, -1, keepdims=True)
        e = jnp.exp(s)
        a = e / jnp.sum(e, -1, keepdims=True)
        attn_maps.append(a)
        proj = proj + (a @ v) @ p["proj_w"][h]
    x1 = x + proj + p["proj_b"][0]

    xn2 = ln(x1, p["ln2_w"], p["ln2_b"])
    ff = jnp.maximum(xn2 @ p["w1"] + p["b1"][0], 0.0) @ p["w2"] + p["b2"][0]
    return x1 + ff, jnp.stack(attn_maps, axis=1)


# ---------------------------------------------------------------------------
if __name__ == "__main__":
    # Module hyperparameters (small, consistent with the PyTorch __init__)
    B = 2
    block_size = T = 8
    embedding_dimension = E = 32
    num_heads = 4
    head_size = 8
    hidden_size = H = 64
    embedding_strategy = "alibi"   # 'basic_positional' -> no additive bias

    key = jax.random.PRNGKey(0)
    ks = jax.random.split(key, 12)
    f = jnp.float32
    init = lambda k, shape, s=0.1: (s * jax.random.normal(k, shape)).astype(f)

    params = {
        "ln1_w": jnp.ones((1, E), f),
        "ln1_b": jnp.zeros((1, E), f),
        # nn.Linear(n_embd, head_size) weights, stored pre-transposed: (heads, E, hs)
        "wq": init(ks[0], (num_heads, E, head_size)),
        "wk": init(ks[1], (num_heads, E, head_size)),
        "wv": init(ks[2], (num_heads, E, head_size)),
        # nn.Linear(num_heads*head_size, E), pre-transposed & split per head
        "proj_w": init(ks[3], (num_heads, head_size, E)),
        "proj_b": init(ks[4], (1, E)),
        "ln2_w": jnp.ones((1, E), f),
        "ln2_b": jnp.zeros((1, E), f),
        # feed-forward: Linear(E, H) -> ReLU -> Linear(H, E), pre-transposed
        "w1": init(ks[5], (E, H)),
        "b1": init(ks[6], (1, H)),
        "w2": init(ks[7], (H, E)),
        "b2": init(ks[8], (1, E)),
    }

    x = jax.random.normal(ks[9], (B, T, E)).astype(f)

    y, attn = decoder_block(x, params, num_heads=num_heads, head_size=head_size,
                            embedding_strategy=embedding_strategy)
    y = jax.block_until_ready(y)
    attn = jax.block_until_ready(attn)

    y_ref, attn_ref = decoder_block_ref(x, params, num_heads=num_heads,
                                        head_size=head_size,
                                        embedding_strategy=embedding_strategy)
    # bf16 MXU operands in the kernel vs f32 reference -> loosened tolerances.
    np.testing.assert_allclose(np.asarray(y), np.asarray(y_ref), rtol=2e-2, atol=2e-2)
    np.testing.assert_allclose(np.asarray(attn), np.asarray(attn_ref), rtol=2e-2, atol=2e-2)

    print("KERNEL_OK")
</pallas_src>

<mosaic_0001>
module attributes {stable_mosaic.version = 11 : i64} {
  func.func @_decoder_block_kernel(%arg0: i32, %arg1: memref<16x32xf32, #tpu.memory_space<vmem>>, %arg2: memref<1x32xf32, #tpu.memory_space<vmem>>, %arg3: memref<1x32xf32, #tpu.memory_space<vmem>>, %arg4: memref<32x96xbf16, #tpu.memory_space<vmem>>, %arg5: memref<32x32xbf16, #tpu.memory_space<vmem>>, %arg6: memref<1x32xf32, #tpu.memory_space<vmem>>, %arg7: memref<1x32xf32, #tpu.memory_space<vmem>>, %arg8: memref<1x32xf32, #tpu.memory_space<vmem>>, %arg9: memref<32x64xbf16, #tpu.memory_space<vmem>>, %arg10: memref<1x64xf32, #tpu.memory_space<vmem>>, %arg11: memref<64x32xbf16, #tpu.memory_space<vmem>>, %arg12: memref<1x32xf32, #tpu.memory_space<vmem>>, %arg13: memref<16x32xf32, #tpu.memory_space<vmem>>, %arg14: memref<2x4x8x8xf32, #tpu.memory_space<vmem>>, %arg15: memref<16x32xbf16, #tpu.memory_space<vmem>>) attributes {dimension_semantics = [#tpu.dimension_semantics<parallel>], iteration_bounds = array<i64: 1>, scalar_prefetch = 0 : i64, scratch_operands = 1 : i64, tpu.core_type = #tpu.core_type<tc>, window_params = [{transform_indices = @transform_0, window_bounds = array<i64: 16, 32>}, {pipeline_mode = #tpu.pipeline_mode<synchronous>, transform_indices = @transform_1, window_bounds = array<i64: 1, 32>}, {pipeline_mode = #tpu.pipeline_mode<synchronous>, transform_indices = @transform_2, window_bounds = array<i64: 1, 32>}, {pipeline_mode = #tpu.pipeline_mode<synchronous>, transform_indices = @transform_3, window_bounds = array<i64: 32, 96>}, {pipeline_mode = #tpu.pipeline_mode<synchronous>, transform_indices = @transform_4, window_bounds = array<i64: 32, 32>}, {pipeline_mode = #tpu.pipeline_mode<synchronous>, transform_indices = @transform_5, window_bounds = array<i64: 1, 32>}, {pipeline_mode = #tpu.pipeline_mode<synchronous>, transform_indices = @transform_6, window_bounds = array<i64: 1, 32>}, {pipeline_mode = #tpu.pipeline_mode<synchronous>, transform_indices = @transform_7, window_bounds = array<i64: 1, 32>}, {pipeline_mode = #tpu.pipeline_mode<synchronous>, transform_indices = @transform_8, window_bounds = array<i64: 32, 64>}, {pipeline_mode = #tpu.pipeline_mode<synchronous>, transform_indices = @transform_9, window_bounds = array<i64: 1, 64>}, {pipeline_mode = #tpu.pipeline_mode<synchronous>, transform_indices = @transform_10, window_bounds = array<i64: 64, 32>}, {pipeline_mode = #tpu.pipeline_mode<synchronous>, transform_indices = @transform_11, window_bounds = array<i64: 1, 32>}, {transform_indices = @transform_12, window_bounds = array<i64: 16, 32>}, {transform_indices = @transform_13, window_bounds = array<i64: 2, 4, 8, 8>}]} {
    %c0 = arith.constant 0 : index
    %c0_0 = arith.constant 0 : index
    %0 = vector.load %arg1[%c0, %c0_0] : memref<16x32xf32, #tpu.memory_space<vmem>>, vector<16x32xf32>
    %cst = arith.constant dense<0.000000e+00> : vector<16xf32>
    %1 = vector.multi_reduction <add>, %0, %cst [1] : vector<16x32xf32> to vector<16xf32>
    %2 = vector.shape_cast %1 : vector<16xf32> to vector<16x1xf32>
    %cst_1 = arith.constant 3.200000e+01 : f32
    %3 = vector.broadcast %cst_1 : f32 to vector<16x1xf32>
    %4 = arith.divf %2, %3 : vector<16x1xf32>
    %5 = vector.broadcast %4 : vector<16x1xf32> to vector<16x32xf32>
    %6 = arith.subf %0, %5 : vector<16x32xf32>
    %7 = arith.mulf %6, %6 : vector<16x32xf32>
    %cst_2 = arith.constant dense<0.000000e+00> : vector<16xf32>
    %8 = vector.multi_reduction <add>, %7, %cst_2 [1] : vector<16x32xf32> to vector<16xf32>
    %9 = vector.shape_cast %8 : vector<16xf32> to vector<16x1xf32>
    %cst_3 = arith.constant 3.200000e+01 : f32
    %10 = vector.broadcast %cst_3 : f32 to vector<16x1xf32>
    %11 = arith.divf %9, %10 : vector<16x1xf32>
    %12 = vector.broadcast %4 : vector<16x1xf32> to vector<16x32xf32>
    %13 = arith.subf %0, %12 : vector<16x32xf32>
    %cst_4 = arith.constant 9.99999974E-6 : f32
    %14 = vector.broadcast %cst_4 : f32 to vector<16x1xf32>
    %15 = arith.addf %11, %14 : vector<16x1xf32>
    %16 = math.rsqrt %15 : vector<16x1xf32>
    %17 = vector.broadcast %16 : vector<16x1xf32> to vector<16x32xf32>
    %18 = arith.mulf %13, %17 : vector<16x32xf32>
    %c0_5 = arith.constant 0 : index
    %c0_6 = arith.constant 0 : index
    %19 = vector.load %arg2[%c0_5, %c0_6] : memref<1x32xf32, #tpu.memory_space<vmem>>, vector<1x32xf32>
    %20 = vector.shape_cast %19 : vector<1x32xf32> to vector<32xf32>
    %21 = vector.shape_cast %20 : vector<32xf32> to vector<1x32xf32>
    %22 = vector.broadcast %21 : vector<1x32xf32> to vector<16x32xf32>
    %23 = arith.mulf %18, %22 : vector<16x32xf32>
    %c0_7 = arith.constant 0 : index
    %c0_8 = arith.constant 0 : index
    %24 = vector.load %arg3[%c0_7, %c0_8] : memref<1x32xf32, #tpu.memory_space<vmem>>, vector<1x32xf32>
    %25 = vector.shape_cast %24 : vector<1x32xf32> to vector<32xf32>
    %26 = vector.shape_cast %25 : vector<32xf32> to vector<1x32xf32>
    %27 = vector.broadcast %26 : vector<1x32xf32> to vector<16x32xf32>
    %28 = arith.addf %23, %27 : vector<16x32xf32>
    %29 = arith.truncf %28 : vector<16x32xf32> to vector<16x32xbf16>
    %c0_9 = arith.constant 0 : index
    %c0_10 = arith.constant 0 : index
    %30 = vector.load %arg4[%c0_9, %c0_10] : memref<32x96xbf16, #tpu.memory_space<vmem>>, vector<32x96xbf16>
    %cst_11 = arith.constant dense<0.000000e+00> : vector<16x96xf32>
    %31 = tpu.matmul %29, %30, %cst_11 {dimension_numbers = #tpu.dot_dimension_numbers<[1], [0], [0], [1], [0, 0, 1, 1], [], []>} : vector<16x32xbf16>, vector<32x96xbf16>, vector<16x96xf32> -> vector<16x96xf32>
    %32 = vector.extract_strided_slice %31 {offsets = [0, 0], sizes = [8, 8], strides = [1, 1]} : vector<16x96xf32> to vector<8x8xf32>
    %33 = vector.extract_strided_slice %31 {offsets = [0, 8], sizes = [8, 8], strides = [1, 1]} : vector<16x96xf32> to vector<8x8xf32>
    %34 = vector.extract_strided_slice %31 {offsets = [0, 16], sizes = [8, 8], strides = [1, 1]} : vector<16x96xf32> to vector<8x8xf32>
    %35 = vector.extract_strided_slice %31 {offsets = [0, 24], sizes = [8, 8], strides = [1, 1]} : vector<16x96xf32> to vector<8x8xf32>
    %36 = vector.extract_strided_slice %31 {offsets = [8, 0], sizes = [8, 8], strides = [1, 1]} : vector<16x96xf32> to vector<8x8xf32>
    %37 = vector.extract_strided_slice %31 {offsets = [8, 8], sizes = [8, 8], strides = [1, 1]} : vector<16x96xf32> to vector<8x8xf32>
    %38 = vector.extract_strided_slice %31 {offsets = [8, 16], sizes = [8, 8], strides = [1, 1]} : vector<16x96xf32> to vector<8x8xf32>
    %39 = vector.extract_strided_slice %31 {offsets = [8, 24], sizes = [8, 8], strides = [1, 1]} : vector<16x96xf32> to vector<8x8xf32>
    %40 = vector.shape_cast %32 : vector<8x8xf32> to vector<1x8x8xf32>
    %41 = vector.shape_cast %33 : vector<8x8xf32> to vector<1x8x8xf32>
    %42 = vector.shape_cast %34 : vector<8x8xf32> to vector<1x8x8xf32>
    %43 = vector.shape_cast %35 : vector<8x8xf32> to vector<1x8x8xf32>
    %44 = vector.shape_cast %36 : vector<8x8xf32> to vector<1x8x8xf32>
    %45 = vector.shape_cast %37 : vector<8x8xf32> to vector<1x8x8xf32>
    %46 = vector.shape_cast %38 : vector<8x8xf32> to vector<1x8x8xf32>
    %47 = vector.shape_cast %39 : vector<8x8xf32> to vector<1x8x8xf32>
    %48 = tpu.concatenate %40, %41, %42, %43, %44, %45, %46, %47 in 0 : vector<1x8x8xf32>, vector<1x8x8xf32>, vector<1x8x8xf32>, vector<1x8x8xf32>, vector<1x8x8xf32>, vector<1x8x8xf32>, vector<1x8x8xf32>, vector<1x8x8xf32> -> vector<8x8x8xf32>
    %49 = arith.truncf %48 : vector<8x8x8xf32> to vector<8x8x8xbf16>
    %50 = vector.extract_strided_slice %31 {offsets = [0, 32], sizes = [8, 8], strides = [1, 1]} : vector<16x96xf32> to vector<8x8xf32>
    %51 = vector.extract_strided_slice %31 {offsets = [0, 40], sizes = [8, 8], strides = [1, 1]} : vector<16x96xf32> to vector<8x8xf32>
    %52 = vector.extract_strided_slice %31 {offsets = [0, 48], sizes = [8, 8], strides = [1, 1]} : vector<16x96xf32> to vector<8x8xf32>
    %53 = vector.extract_strided_slice %31 {offsets = [0, 56], sizes = [8, 8], strides = [1, 1]} : vector<16x96xf32> to vector<8x8xf32>
    %54 = vector.extract_strided_slice %31 {offsets = [8, 32], sizes = [8, 8], strides = [1, 1]} : vector<16x96xf32> to vector<8x8xf32>
    %55 = vector.extract_strided_slice %31 {offsets = [8, 40], sizes = [8, 8], strides = [1, 1]} : vector<16x96xf32> to vector<8x8xf32>
    %56 = vector.extract_strided_slice %31 {offsets = [8, 48], sizes = [8, 8], strides = [1, 1]} : vector<16x96xf32> to vector<8x8xf32>
    %57 = vector.extract_strided_slice %31 {offsets = [8, 56], sizes = [8, 8], strides = [1, 1]} : vector<16x96xf32> to vector<8x8xf32>
    %58 = vector.shape_cast %50 : vector<8x8xf32> to vector<1x8x8xf32>
    %59 = vector.shape_cast %51 : vector<8x8xf32> to vector<1x8x8xf32>
    %60 = vector.shape_cast %52 : vector<8x8xf32> to vector<1x8x8xf32>
    %61 = vector.shape_cast %53 : vector<8x8xf32> to vector<1x8x8xf32>
    %62 = vector.shape_cast %54 : vector<8x8xf32> to vector<1x8x8xf32>
    %63 = vector.shape_cast %55 : vector<8x8xf32> to vector<1x8x8xf32>
    %64 = vector.shape_cast %56 : vector<8x8xf32> to vector<1x8x8xf32>
    %65 = vector.shape_cast %57 : vector<8x8xf32> to vector<1x8x8xf32>
    %66 = tpu.concatenate %58, %59, %60, %61, %62, %63, %64, %65 in 0 : vector<1x8x8xf32>, vector<1x8x8xf32>, vector<1x8x8xf32>, vector<1x8x8xf32>, vector<1x8x8xf32>, vector<1x8x8xf32>, vector<1x8x8xf32>, vector<1x8x8xf32> -> vector<8x8x8xf32>
    %67 = arith.truncf %66 : vector<8x8x8xf32> to vector<8x8x8xbf16>
    %68 = vector.extract_strided_slice %31 {offsets = [0, 64], sizes = [8, 8], strides = [1, 1]} : vector<16x96xf32> to vector<8x8xf32>
    %69 = vector.extract_strided_slice %31 {offsets = [0, 72], sizes = [8, 8], strides = [1, 1]} : vector<16x96xf32> to vector<8x8xf32>
    %70 = vector.extract_strided_slice %31 {offsets = [0, 80], sizes = [8, 8], strides = [1, 1]} : vector<16x96xf32> to vector<8x8xf32>
    %71 = vector.extract_strided_slice %31 {offsets = [0, 88], sizes = [8, 8], strides = [1, 1]} : vector<16x96xf32> to vector<8x8xf32>
    %72 = vector.extract_strided_slice %31 {offsets = [8, 64], sizes = [8, 8], strides = [1, 1]} : vector<16x96xf32> to vector<8x8xf32>
    %73 = vector.extract_strided_slice %31 {offsets = [8, 72], sizes = [8, 8], strides = [1, 1]} : vector<16x96xf32> to vector<8x8xf32>
    %74 = vector.extract_strided_slice %31 {offsets = [8, 80], sizes = [8, 8], strides = [1, 1]} : vector<16x96xf32> to vector<8x8xf32>
    %75 = vector.extract_strided_slice %31 {offsets = [8, 88], sizes = [8, 8], strides = [1, 1]} : vector<16x96xf32> to vector<8x8xf32>
    %76 = vector.shape_cast %68 : vector<8x8xf32> to vector<1x8x8xf32>
    %77 = vector.shape_cast %69 : vector<8x8xf32> to vector<1x8x8xf32>
    %78 = vector.shape_cast %70 : vector<8x8xf32> to vector<1x8x8xf32>
    %79 = vector.shape_cast %71 : vector<8x8xf32> to vector<1x8x8xf32>
    %80 = vector.shape_cast %72 : vector<8x8xf32> to vector<1x8x8xf32>
    %81 = vector.shape_cast %73 : vector<8x8xf32> to vector<1x8x8xf32>
    %82 = vector.shape_cast %74 : vector<8x8xf32> to vector<1x8x8xf32>
    %83 = vector.shape_cast %75 : vector<8x8xf32> to vector<1x8x8xf32>
    %84 = tpu.concatenate %76, %77, %78, %79, %80, %81, %82, %83 in 0 : vector<1x8x8xf32>, vector<1x8x8xf32>, vector<1x8x8xf32>, vector<1x8x8xf32>, vector<1x8x8xf32>, vector<1x8x8xf32>, vector<1x8x8xf32>, vector<1x8x8xf32> -> vector<8x8x8xf32>
    %85 = arith.truncf %84 : vector<8x8x8xf32> to vector<8x8x8xbf16>
    "tpu.trace_start"() <{level = 10 : i32, message = "gtd,gsd->gts"}> : () -> ()
    %cst_12 = arith.constant dense<0.000000e+00> : vector<8x8x8xf32>
    %86 = tpu.matmul %49, %67, %cst_12 {dimension_numbers = #tpu.dot_dimension_numbers<[2], [2], [1], [1], [0, 0, 0, 1, 1, 1], [0], [0]>} : vector<8x8x8xbf16>, vector<8x8x8xbf16>, vector<8x8x8xf32> -> vector<8x8x8xf32>
    "tpu.trace_stop"() : () -> ()
    %87 = tpu.iota {dimensions = array<i32: 0>} : vector<8x8xi32>
    %88 = tpu.iota {dimensions = array<i32: 1>} : vector<8x8xi32>
    %89 = arith.cmpi sle, %88, %87 : vector<8x8xi32>
    %90 = arith.subi %88, %87 : vector<8x8xi32>
    %91 = arith.sitofp %90 : vector<8x8xi32> to vector<8x8xf32>
    %cst_13 = arith.constant 0.176776692 : f32
    %92 = vector.broadcast %cst_13 : f32 to vector<8x8xf32>
    %93 = arith.mulf %91, %92 : vector<8x8xf32>
    %cst_14 = arith.constant 0.000000e+00 : f32
    %94 = vector.broadcast %cst_14 : f32 to vector<8x8xf32>
    %95 = arith.select %89, %93, %94 : vector<8x8xi1>, vector<8x8xf32>
    %96 = vector.shape_cast %95 : vector<8x8xf32> to vector<1x8x8xf32>
    %97 = vector.broadcast %96 : vector<1x8x8xf32> to vector<8x8x8xf32>
    %98 = arith.addf %86, %97 : vector<8x8x8xf32>
    %99 = vector.shape_cast %89 : vector<8x8xi1> to vector<1x8x8xi1>
    %cst_15 = arith.constant -1.000000e+30 : f32
    %100 = vector.shape_cast %99 : vector<1x8x8xi1> to vector<1x8x8xi1>
    %101 = vector.broadcast %100 : vector<1x8x8xi1> to vector<8x8x8xi1>
    %102 = vector.broadcast %cst_15 : f32 to vector<8x8x8xf32>
    %103 = arith.select %101, %98, %102 : vector<8x8x8xi1>, vector<8x8x8xf32>
    %cst_16 = arith.constant dense<0xFF800000> : vector<8x8xf32>
    %104 = vector.multi_reduction <maximumf>, %103, %cst_16 [2] : vector<8x8x8xf32> to vector<8x8xf32>
    %105 = vector.shape_cast %104 : vector<8x8xf32> to vector<8x8x1xf32>
    %106 = vector.broadcast %105 : vector<8x8x1xf32> to vector<8x8x8xf32>
    %107 = arith.subf %103, %106 : vector<8x8x8xf32>
    %108 = math.exp %107 : vector<8x8x8xf32>
    %cst_17 = arith.constant dense<0.000000e+00> : vector<8x8xf32>
    %109 = vector.multi_reduction <add>, %108, %cst_17 [2] : vector<8x8x8xf32> to vector<8x8xf32>
    %110 = vector.shape_cast %109 : vector<8x8xf32> to vector<8x8x1xf32>
    %111 = vector.broadcast %110 : vector<8x8x1xf32> to vector<8x8x8xf32>
    %112 = arith.divf %108, %111 : vector<8x8x8xf32>
    %113 = vector.shape_cast %112 : vector<8x8x8xf32> to vector<2x4x8x8xf32>
    %c0_18 = arith.constant 0 : index
    %c0_19 = arith.constant 0 : index
    %c0_20 = arith.constant 0 : index
    %c0_21 = arith.constant 0 : index
    %114 = vector.load %arg14[%c0_18, %c0_19, %c0_20, %c0_21] : memref<2x4x8x8xf32, #tpu.memory_space<vmem>>, vector<2x4x8x8xf32>
    tpu.vector_store %arg14[%c0_18, %c0_19, %c0_20, %c0_21], %113 {strides = array<i32>} : memref<2x4x8x8xf32, #tpu.memory_space<vmem>>, vector<2x4x8x8xf32>,
    %115 = arith.truncf %112 : vector<8x8x8xf32> to vector<8x8x8xbf16>
    "tpu.trace_start"() <{level = 10 : i32, message = "gts,gsd->gtd"}> : () -> ()
    %cst_22 = arith.constant dense<0.000000e+00> : vector<8x8x8xf32>
    %116 = tpu.matmul %115, %85, %cst_22 {dimension_numbers = #tpu.dot_dimension_numbers<[2], [1], [1], [2], [0, 0, 0, 1, 1, 2], [0], [0]>} : vector<8x8x8xbf16>, vector<8x8x8xbf16>, vector<8x8x8xf32> -> vector<8x8x8xf32>
    "tpu.trace_stop"() : () -> ()
    %117 = arith.truncf %116 : vector<8x8x8xf32> to vector<8x8x8xbf16>
    %118 = vector.extract_strided_slice %117 {offsets = [0, 0, 0], sizes = [1, 8, 8], strides = [1, 1, 1]} : vector<8x8x8xbf16> to vector<1x8x8xbf16>
    %119 = vector.shape_cast %118 : vector<1x8x8xbf16> to vector<8x8xbf16>
    %c0_23 = arith.constant 0 : index
    %c0_24 = arith.constant 0 : index
    %120 = vector.load %arg15[%c0_23, %c0_24] : memref<16x32xbf16, #tpu.memory_space<vmem>>, vector<8x8xbf16>
    tpu.vector_store %arg15[%c0_23, %c0_24], %119 {strides = array<i32>} : memref<16x32xbf16, #tpu.memory_space<vmem>>, vector<8x8xbf16>,
    %121 = vector.extract_strided_slice %117 {offsets = [1, 0, 0], sizes = [1, 8, 8], strides = [1, 1, 1]} : vector<8x8x8xbf16> to vector<1x8x8xbf16>
    %122 = vector.shape_cast %121 : vector<1x8x8xbf16> to vector<8x8xbf16>
    %c0_25 = arith.constant 0 : index
    %c8 = arith.constant 8 : index
    %123 = vector.load %arg15[%c0_25, %c8] : memref<16x32xbf16, #tpu.memory_space<vmem>>, vector<8x8xbf16>
    tpu.vector_store %arg15[%c0_25, %c8], %122 {strides = array<i32>} : memref<16x32xbf16, #tpu.memory_space<vmem>>, vector<8x8xbf16>,
    %124 = vector.extract_strided_slice %117 {offsets = [2, 0, 0], sizes = [1, 8, 8], strides = [1, 1, 1]} : vector<8x8x8xbf16> to vector<1x8x8xbf16>
    %125 = vector.shape_cast %124 : vector<1x8x8xbf16> to vector<8x8xbf16>
    %c0_26 = arith.constant 0 : index
    %c16 = arith.constant 16 : index
    %126 = vector.load %arg15[%c0_26, %c16] : memref<16x32xbf16, #tpu.memory_space<vmem>>, vector<8x8xbf16>
    tpu.vector_store %arg15[%c0_26, %c16], %125 {strides = array<i32>} : memref<16x32xbf16, #tpu.memory_space<vmem>>, vector<8x8xbf16>,
    %127 = vector.extract_strided_slice %117 {offsets = [3, 0, 0], sizes = [1, 8, 8], strides = [1, 1, 1]} : vector<8x8x8xbf16> to vector<1x8x8xbf16>
    %128 = vector.shape_cast %127 : vector<1x8x8xbf16> to vector<8x8xbf16>
    %c0_27 = arith.constant 0 : index
    %c24 = arith.constant 24 : index
    %129 = vector.load %arg15[%c0_27, %c24] : memref<16x32xbf16, #tpu.memory_space<vmem>>, vector<8x8xbf16>
    tpu.vector_store %arg15[%c0_27, %c24], %128 {strides = array<i32>} : memref<16x32xbf16, #tpu.memory_space<vmem>>, vector<8x8xbf16>,
    %130 = vector.extract_strided_slice %117 {offsets = [4, 0, 0], sizes = [1, 8, 8], strides = [1, 1, 1]} : vector<8x8x8xbf16> to vector<1x8x8xbf16>
    %131 = vector.shape_cast %130 : vector<1x8x8xbf16> to vector<8x8xbf16>
    %c8_28 = arith.constant 8 : index
    %c0_29 = arith.constant 0 : index
    %132 = vector.load %arg15[%c8_28, %c0_29] : memref<16x32xbf16, #tpu.memory_space<vmem>>, vector<8x8xbf16>
    tpu.vector_store %arg15[%c8_28, %c0_29], %131 {strides = array<i32>} : memref<16x32xbf16, #tpu.memory_space<vmem>>, vector<8x8xbf16>,
    %133 = vector.extract_strided_slice %117 {offsets = [5, 0, 0], sizes = [1, 8, 8], strides = [1, 1, 1]} : vector<8x8x8xbf16> to vector<1x8x8xbf16>
    %134 = vector.shape_cast %133 : vector<1x8x8xbf16> to vector<8x8xbf16>
    %c8_30 = arith.constant 8 : index
    %c8_31 = arith.constant 8 : index
    %135 = vector.load %arg15[%c8_30, %c8_31] : memref<16x32xbf16, #tpu.memory_space<vmem>>, vector<8x8xbf16>
    tpu.vector_store %arg15[%c8_30, %c8_31], %134 {strides = array<i32>} : memref<16x32xbf16, #tpu.memory_space<vmem>>, vector<8x8xbf16>,
    %136 = vector.extract_strided_slice %117 {offsets = [6, 0, 0], sizes = [1, 8, 8], strides = [1, 1, 1]} : vector<8x8x8xbf16> to vector<1x8x8xbf16>
    %137 = vector.shape_cast %136 : vector<1x8x8xbf16> to vector<8x8xbf16>
    %c8_32 = arith.constant 8 : index
    %c16_33 = arith.constant 16 : index
    %138 = vector.load %arg15[%c8_32, %c16_33] : memref<16x32xbf16, #tpu.memory_space<vmem>>, vector<8x8xbf16>
    tpu.vector_store %arg15[%c8_32, %c16_33], %137 {strides = array<i32>} : memref<16x32xbf16, #tpu.memory_space<vmem>>, vector<8x8xbf16>,
    %139 = vector.extract_strided_slice %117 {offsets = [7, 0, 0], sizes = [1, 8, 8], strides = [1, 1, 1]} : vector<8x8x8xbf16> to vector<1x8x8xbf16>
    %140 = vector.shape_cast %139 : vector<1x8x8xbf16> to vector<8x8xbf16>
    %c8_34 = arith.constant 8 : index
    %c24_35 = arith.constant 24 : index
    %141 = vector.load %arg15[%c8_34, %c24_35] : memref<16x32xbf16, #tpu.memory_space<vmem>>, vector<8x8xbf16>
    tpu.vector_store %arg15[%c8_34, %c24_35], %140 {strides = array<i32>} : memref<16x32xbf16, #tpu.memory_space<vmem>>, vector<8x8xbf16>,
    %c0_36 = arith.constant 0 : index
    %c0_37 = arith.constant 0 : index
    %142 = vector.load %arg15[%c0_36, %c0_37] : memref<16x32xbf16, #tpu.memory_space<vmem>>, vector<16x32xbf16>
    %c0_38 = arith.constant 0 : index
    %c0_39 = arith.constant 0 : index
    %143 = vector.load %arg5[%c0_38, %c0_39] : memref<32x32xbf16, #tpu.memory_space<vmem>>, vector<32x32xbf16>
    %cst_40 = arith.constant dense<0.000000e+00> : vector<16x32xf32>
    %144 = tpu.matmul %142, %143, %cst_40 {dimension_numbers = #tpu.dot_dimension_numbers<[1], [0], [0], [1], [0, 0, 1, 1], [], []>} : vector<16x32xbf16>, vector<32x32xbf16>, vector<16x32xf32> -> vector<16x32xf32>
    %c0_41 = arith.constant 0 : index
    %c0_42 = arith.constant 0 : index
    %145 = vector.load %arg6[%c0_41, %c0_42] : memref<1x32xf32, #tpu.memory_space<vmem>>, vector<1x32xf32>
    %146 = vector.shape_cast %145 : vector<1x32xf32> to vector<32xf32>
    %147 = vector.shape_cast %146 : vector<32xf32> to vector<1x32xf32>
    %148 = vector.broadcast %147 : vector<1x32xf32> to vector<16x32xf32>
    %149 = arith.addf %144, %148 : vector<16x32xf32>
    %150 = arith.addf %0, %149 : vector<16x32xf32>
    %cst_43 = arith.constant dense<0.000000e+00> : vector<16xf32>
    %151 = vector.multi_reduction <add>, %150, %cst_43 [1] : vector<16x32xf32> to vector<16xf32>
    %152 = vector.shape_cast %151 : vector<16xf32> to vector<16x1xf32>
    %cst_44 = arith.constant 3.200000e+01 : f32
    %153 = vector.broadcast %cst_44 : f32 to vector<16x1xf32>
    %154 = arith.divf %152, %153 : vector<16x1xf32>
    %155 = vector.broadcast %154 : vector<16x1xf32> to vector<16x32xf32>
    %156 = arith.subf %150, %155 : vector<16x32xf32>
    %157 = arith.mulf %156, %156 : vector<16x32xf32>
    %cst_45 = arith.constant dense<0.000000e+00> : vector<16xf32>
    %158 = vector.multi_reduction <add>, %157, %cst_45 [1] : vector<16x32xf32> to vector<16xf32>
    %159 = vector.shape_cast %158 : vector<16xf32> to vector<16x1xf32>
    %cst_46 = arith.constant 3.200000e+01 : f32
    %160 = vector.broadcast %cst_46 : f32 to vector<16x1xf32>
    %161 = arith.divf %159, %160 : vector<16x1xf32>
    %162 = vector.broadcast %154 : vector<16x1xf32> to vector<16x32xf32>
    %163 = arith.subf %150, %162 : vector<16x32xf32>
    %cst_47 = arith.constant 9.99999974E-6 : f32
    %164 = vector.broadcast %cst_47 : f32 to vector<16x1xf32>
    %165 = arith.addf %161, %164 : vector<16x1xf32>
    %166 = math.rsqrt %165 : vector<16x1xf32>
    %167 = vector.broadcast %166 : vector<16x1xf32> to vector<16x32xf32>
    %168 = arith.mulf %163, %167 : vector<16x32xf32>
    %c0_48 = arith.constant 0 : index
    %c0_49 = arith.constant 0 : index
    %169 = vector.load %arg7[%c0_48, %c0_49] : memref<1x32xf32, #tpu.memory_space<vmem>>, vector<1x32xf32>
    %170 = vector.shape_cast %169 : vector<1x32xf32> to vector<32xf32>
    %171 = vector.shape_cast %170 : vector<32xf32> to vector<1x32xf32>
    %172 = vector.broadcast %171 : vector<1x32xf32> to vector<16x32xf32>
    %173 = arith.mulf %168, %172 : vector<16x32xf32>
    %c0_50 = arith.constant 0 : index
    %c0_51 = arith.constant 0 : index
    %174 = vector.load %arg8[%c0_50, %c0_51] : memref<1x32xf32, #tpu.memory_space<vmem>>, vector<1x32xf32>
    %175 = vector.shape_cast %174 : vector<1x32xf32> to vector<32xf32>
    %176 = vector.shape_cast %175 : vector<32xf32> to vector<1x32xf32>
    %177 = vector.broadcast %176 : vector<1x32xf32> to vector<16x32xf32>
    %178 = arith.addf %173, %177 : vector<16x32xf32>
    %179 = arith.truncf %178 : vector<16x32xf32> to vector<16x32xbf16>
    %c0_52 = arith.constant 0 : index
    %c0_53 = arith.constant 0 : index
    %180 = vector.load %arg9[%c0_52, %c0_53] : memref<32x64xbf16, #tpu.memory_space<vmem>>, vector<32x64xbf16>
    %cst_54 = arith.constant dense<0.000000e+00> : vector<16x64xf32>
    %181 = tpu.matmul %179, %180, %cst_54 {dimension_numbers = #tpu.dot_dimension_numbers<[1], [0], [0], [1], [0, 0, 1, 1], [], []>} : vector<16x32xbf16>, vector<32x64xbf16>, vector<16x64xf32> -> vector<16x64xf32>
    %c0_55 = arith.constant 0 : index
    %c0_56 = arith.constant 0 : index
    %182 = vector.load %arg10[%c0_55, %c0_56] : memref<1x64xf32, #tpu.memory_space<vmem>>, vector<1x64xf32>
    %183 = vector.shape_cast %182 : vector<1x64xf32> to vector<64xf32>
    %184 = vector.shape_cast %183 : vector<64xf32> to vector<1x64xf32>
    %185 = vector.broadcast %184 : vector<1x64xf32> to vector<16x64xf32>
    %186 = arith.addf %181, %185 : vector<16x64xf32>
    %cst_57 = arith.constant 0.000000e+00 : f32
    %187 = vector.broadcast %cst_57 : f32 to vector<16x64xf32>
    %188 = arith.maximumf %186, %187 : vector<16x64xf32>
    %189 = arith.truncf %188 : vector<16x64xf32> to vector<16x64xbf16>
    %c0_58 = arith.constant 0 : index
    %c0_59 = arith.constant 0 : index
    %190 = vector.load %arg11[%c0_58, %c0_59] : memref<64x32xbf16, #tpu.memory_space<vmem>>, vector<64x32xbf16>
    %cst_60 = arith.constant dense<0.000000e+00> : vector<16x32xf32>
    %191 = tpu.matmul %189, %190, %cst_60 {dimension_numbers = #tpu.dot_dimension_numbers<[1], [0], [0], [1], [0, 0, 1, 1], [], []>} : vector<16x64xbf16>, vector<64x32xbf16>, vector<16x32xf32> -> vector<16x32xf32>
    %c0_61 = arith.constant 0 : index
    %c0_62 = arith.constant 0 : index
    %192 = vector.load %arg12[%c0_61, %c0_62] : memref<1x32xf32, #tpu.memory_space<vmem>>, vector<1x32xf32>
    %193 = vector.shape_cast %192 : vector<1x32xf32> to vector<32xf32>
    %194 = vector.shape_cast %193 : vector<32xf32> to vector<1x32xf32>
    %195 = vector.broadcast %194 : vector<1x32xf32> to vector<16x32xf32>
    %196 = arith.addf %191, %195 : vector<16x32xf32>
    %197 = arith.addf %150, %196 : vector<16x32xf32>
    %c0_63 = arith.constant 0 : index
    %c0_64 = arith.constant 0 : index
    %198 = vector.load %arg13[%c0_63, %c0_64] : memref<16x32xf32, #tpu.memory_space<vmem>>, vector<16x32xf32>
    tpu.vector_store %arg13[%c0_63, %c0_64], %197 {strides = array<i32>} : memref<16x32xf32, #tpu.memory_space<vmem>>, vector<16x32xf32>,
    return
  }
  func.func @transform_0(%arg0: i32) -> (i32, i32) {
    %c0_i32 = arith.constant 0 : i32
    %c0_i32_0 = arith.constant 0 : i32
    return %arg0, %c0_i32 : i32, i32
  }
  func.func @transform_1(%arg0: i32) -> (i32, i32) {
    %c0_i32 = arith.constant 0 : i32
    %c0_i32_0 = arith.constant 0 : i32
    %c0_i32_1 = arith.constant 0 : i32
    return %c0_i32, %c0_i32_0 : i32, i32
  }
  func.func @transform_2(%arg0: i32) -> (i32, i32) {
    %c0_i32 = arith.constant 0 : i32
    %c0_i32_0 = arith.constant 0 : i32
    %c0_i32_1 = arith.constant 0 : i32
    return %c0_i32, %c0_i32_0 : i32, i32
  }
  func.func @transform_3(%arg0: i32) -> (i32, i32) {
    %c0_i32 = arith.constant 0 : i32
    %c0_i32_0 = arith.constant 0 : i32
    %c0_i32_1 = arith.constant 0 : i32
    return %c0_i32, %c0_i32_0 : i32, i32
  }
  func.func @transform_4(%arg0: i32) -> (i32, i32) {
    %c0_i32 = arith.constant 0 : i32
    %c0_i32_0 = arith.constant 0 : i32
    %c0_i32_1 = arith.constant 0 : i32
    return %c0_i32, %c0_i32_0 : i32, i32
  }
  func.func @transform_5(%arg0: i32) -> (i32, i32) {
    %c0_i32 = arith.constant 0 : i32
    %c0_i32_0 = arith.constant 0 : i32
    %c0_i32_1 = arith.constant 0 : i32
    return %c0_i32, %c0_i32_0 : i32, i32
  }
  func.func @transform_6(%arg0: i32) -> (i32, i32) {
    %c0_i32 = arith.constant 0 : i32
    %c0_i32_0 = arith.constant 0 : i32
    %c0_i32_1 = arith.constant 0 : i32
    return %c0_i32, %c0_i32_0 : i32, i32
  }
  func.func @transform_7(%arg0: i32) -> (i32, i32) {
    %c0_i32 = arith.constant 0 : i32
    %c0_i32_0 = arith.constant 0 : i32
    %c0_i32_1 = arith.constant 0 : i32
    return %c0_i32, %c0_i32_0 : i32, i32
  }
  func.func @transform_8(%arg0: i32) -> (i32, i32) {
    %c0_i32 = arith.constant 0 : i32
    %c0_i32_0 = arith.constant 0 : i32
    %c0_i32_1 = arith.constant 0 : i32
    return %c0_i32, %c0_i32_0 : i32, i32
  }
  func.func @transform_9(%arg0: i32) -> (i32, i32) {
    %c0_i32 = arith.constant 0 : i32
    %c0_i32_0 = arith.constant 0 : i32
    %c0_i32_1 = arith.constant 0 : i32
    return %c0_i32, %c0_i32_0 : i32, i32
  }
  func.func @transform_10(%arg0: i32) -> (i32, i32) {
    %c0_i32 = arith.constant 0 : i32
    %c0_i32_0 = arith.constant 0 : i32
    %c0_i32_1 = arith.constant 0 : i32
    return %c0_i32, %c0_i32_0 : i32, i32
  }
  func.func @transform_11(%arg0: i32) -> (i32, i32) {
    %c0_i32 = arith.constant 0 : i32
    %c0_i32_0 = arith.constant 0 : i32
    %c0_i32_1 = arith.constant 0 : i32
    return %c0_i32, %c0_i32_0 : i32, i32
  }
  func.func @transform_12(%arg0: i32) -> (i32, i32) {
    %c0_i32 = arith.constant 0 : i32
    %c0_i32_0 = arith.constant 0 : i32
    return %arg0, %c0_i32 : i32, i32
  }
  func.func @transform_13(%arg0: i32) -> (i32, i32, i32, i32) {
    %c0_i32 = arith.constant 0 : i32
    %c0_i32_0 = arith.constant 0 : i32
    %c0_i32_1 = arith.constant 0 : i32
    %c0_i32_2 = arith.constant 0 : i32
    return %arg0, %c0_i32, %c0_i32_0, %c0_i32_1 : i32, i32, i32, i32
  }
}

</mosaic_0001>

<bundles_post_ra>
// kernel: tpu_custom_call.1
= control target key start
LH: loop header
LB: loop body
LE: loop exit
PB: predicated region body
PF: predicated region fallthrough
CT: control target
= control target key end

     0   :  { %19 = vsyncpa [#allocation4], 0  ;;  %s2410_s0 = inlined_call_operand.vmem [shape: f32[16,32], index: 0, kind: input, shape index: {}]   ;;  %s2411_s1 = inlined_call_operand.vmem [shape: f32[1,32], index: 1, kind: input, shape index: {}]   ;;  %s2412_s2 = inlined_call_operand.vmem [shape: f32[1,32], index: 2, kind: input, shape index: {}]   ;;  %s2413_s3 = inlined_call_operand.vmem [shape: bf16[32,96], index: 3, kind: input, shape index: {}]   ;;  %s2414_s4 = inlined_call_operand.vmem [shape: bf16[32,32], index: 4, kind: input, shape index: {}]   ;;  %s2415_s5 = inlined_call_operand.hbm [shape: f32[1,32], index: 5, kind: input, shape index: {}]   ;;  %s2416_s6 = inlined_call_operand.hbm [shape: f32[1,32], index: 6, kind: input, shape index: {}]   ;;  %s2417_s7 = inlined_call_operand.hbm [shape: f32[1,32], index: 7, kind: input, shape index: {}]   ;;  %s2418_s8 = inlined_call_operand.hbm [shape: bf16[32,64], index: 8, kind: input, shape index: {}]   ;;  %s2419_s9 = inlined_call_operand.hbm [shape: f32[1,64], index: 9, kind: input, shape index: {}]   ;;  %s2420_s10 = inlined_call_operand.vmem [shape: bf16[64,32], index: 10, kind: input, shape index: {}]   ;;  %s2421_s11 = inlined_call_operand.vmem [shape: f32[1,32], index: 11, kind: input, shape index: {}]   ;;  %s2422_s12 = inlined_call_operand.hbm [shape: f32[16,32], index: 12, kind: output, shape index: {0}]   ;;  %s2423_s13 = inlined_call_operand.hbm [shape: f32[2,4,8,8], index: 13, kind: output, shape index: {1}]  }
   0x1   :  { %20 = vsyncpa [#allocation7], 0 }
   0x2   :  { %21 = vsyncpa [#allocation10], 0 }
   0x3   :  { %22 = vsyncpa [#allocation5], 0 }
   0x4   :  { %23 = vsyncpa [#allocation14], 0  ;;  %s1962_s25 = smov [#allocation6]   ;;  %s1963_s27 = smov [#allocation9]  }
   0x5   :  { %s50_s26 = sshll.u32 %s1962_s25, 4  ;;  %s69_s28 = sshll.u32 %s1963_s27, 4  ;;  %s51_s26 = int_to_ptr.vmem [resolvable:$true] %s50_s26  ;;  %s70_s28 = int_to_ptr.vmem [resolvable:$true] %s69_s28 }
   0x6   :  { %s1820_s29 = scalar_lea.vmem %s51_s26, 16  ;;  %s1824_s30 = scalar_lea.vmem %s51_s26, 32 }
   0x7   :  { %p1821_p0 = scmp.ne.s32.totalorder %s51_s26, %s1820_s29  ;;  %p1825_p1 = scmp.lt.s32.totalorder %s51_s26, %s51_s26 }
   0x8   :  { %p1826_p2 = scmp.lt.s32.totalorder %s1824_s30, %s1820_s29 }
   0xa   :  { %p1827_p3 = por %p1826_p2, %p1825_p1 }
   0xc   :  { %p1828_p4 = pnand %p1827_p3, %p1821_p0 }
   0xe   :  { %1831 = shalt.err (!%p1828_p4)
}
   0xf   :  { %53 = dma.hbm_to_vmem [thread:$0]  %s2416_s6, 16, %s51_s26, [#allocation7]  }
  0x10   :  { %s1840_s16 = scalar_lea.vmem %s70_s28, 256  ;;  %p1845_p6 = scmp.lt.s32.totalorder %s70_s28, %s70_s28 }
  0x11   :  { %p1841_p5 = scmp.ne.s32.totalorder %s70_s28, %s1840_s16  ;;  %p1846_p7 = scmp.lt.s32.totalorder %s1840_s16, %s1840_s16 }
  0x13   :  { %p1847_p8 = por %p1846_p7, %p1845_p6 }
  0x15   :  { %p1848_p9 = pnand %p1847_p8, %p1841_p5 }
  0x17   :  { %1851 = shalt.err (!%p1848_p9)
}
  0x18   :  { %s1964_s17 = smov 64   ;;  %s1965_s18 = smov 4  }
  0x19   :  { %75 = dma.hbm_to_vmem [thread:$0]  %s2418_s8, 256, %s70_s28, [#allocation10], %s1964_s17, %s1964_s17, %s1965_s18  }
  0x1a   :  { %s1966_s21 = smov [#allocation3]   ;;  %s1967_s23 = smov [#allocation8]  }
  0x1b   :  { %s40_s22 = sshll.u32 %s1966_s21, 4  ;;  %s60_s24 = sshll.u32 %s1967_s23, 4  ;;  %s41_s22 = int_to_ptr.vmem [resolvable:$true] %s40_s22  ;;  %s61_s24 = int_to_ptr.vmem [resolvable:$true] %s60_s24 }
  0x1c   :  { %s1860_s6 = scalar_lea.vmem %s41_s22, 16  ;;  %s1864_s25 = scalar_lea.vmem %s41_s22, 32 }
  0x1d   :  { %p1861_p10 = scmp.ne.s32.totalorder %s41_s22, %s1860_s6  ;;  %p1865_p11 = scmp.lt.s32.totalorder %s41_s22, %s41_s22 }
  0x1e   :  { %p1866_p12 = scmp.lt.s32.totalorder %s1864_s25, %s1860_s6 }
  0x20   :  { %p1867_p13 = por %p1866_p12, %p1865_p11 }
  0x22   :  { %p1868_p0 = pnand %p1867_p13, %p1861_p10 }
  0x24   :  { %1871 = shalt.err (!%p1868_p0)
}
  0x25   :  { %43 = dma.hbm_to_vmem [thread:$0]  %s2415_s5, 16, %s41_s22, [#allocation4]  }
  0x26   :  { %s1880_s29 = scalar_lea.vmem %s61_s24, 16  ;;  %s1884_s8 = scalar_lea.vmem %s61_s24, 32 }
  0x27   :  { %p1881_p1 = scmp.ne.s32.totalorder %s61_s24, %s1880_s29  ;;  %p1885_p2 = scmp.lt.s32.totalorder %s61_s24, %s61_s24 }
  0x28   :  { %p1886_p3 = scmp.lt.s32.totalorder %s1884_s8, %s1880_s29 }
  0x2a   :  { %p1887_p4 = por %p1886_p3, %p1885_p2 }
  0x2c   :  { %p1888_p5 = pnand %p1887_p4, %p1881_p1 }
  0x2e   :  { %1891 = shalt.err (!%p1888_p5)
}
  0x2f   :  { %63 = dma.hbm_to_vmem [thread:$0]  %s2417_s7, 16, %s61_s24, [#allocation7]  }
  0x30   :  { %s1968_s14 = smov [#allocation11]  }
  0x31   :  { %s82_s15 = sshll.u32 %s1968_s14, 4  ;;  %s83_s15 = int_to_ptr.vmem [resolvable:$true] %s82_s15 }
  0x32   :  { %s1900_s16 = scalar_lea.vmem %s83_s15, 16  ;;  %s1904_s18 = scalar_lea.vmem %s83_s15, 32 }
  0x33   :  { %p1901_p6 = scmp.ne.s32.totalorder %s83_s15, %s1900_s16  ;;  %p1905_p7 = scmp.lt.s32.totalorder %s83_s15, %s83_s15 }
  0x34   :  { %p1906_p8 = scmp.lt.s32.totalorder %s1904_s18, %s1900_s16 }
  0x36   :  { %p1907_p9 = por %p1906_p8, %p1905_p7 }
  0x38   :  { %p1908_p10 = pnand %p1907_p9, %p1901_p6 }
  0x3a   :  { %1911 = shalt.err (!%p1908_p10)
}
  0x3b   :  { %85 = dma.hbm_to_vmem [thread:$0]  %s2419_s9, 16, %s83_s15, [#allocation10]  }
  0x3c   :  { %1952 = dma.done.wait [#allocation4], 16  }
  0x3d   :  { %1953 = vsyncadd [#allocation4], 4294967280 }
  0x3e   :  { %1954 = dma.done.wait [#allocation7], 32  }
  0x3f   :  { %1955 = vsyncadd [#allocation7], 4294967264 }
  0x40   :  { %1956 = dma.done.wait [#allocation10], 272  }
  0x41   :  { %1957 = vsyncadd [#allocation10], 4294967024  ;;  %vm108_vm0 = vcmask 261120   ;;  %v2071_v0 = vld [vmem:[%s2410_s0] sm:$0xff]  ;;  %v2076_v1 = vld [vmem:[%s2410_s0 + $0x8] sm:$0xff]  ;;  %v1969_v15 = vmov 0.0  }
  0x42   :  { %v109_v2 = vsel %vm108_vm0, %v2071_v0, 0.0  ;;  %v112_v3 = vsel %vm108_vm0, %v2076_v1, 0.0  ;;  %v1761_v14 = vld [vmem:[%s2413_s3 + $0x8] sm:$0xff]   ;;  %1610 = vmatprep.subr.bf16.mxu0 %v1969_v15  ;;  %vm1970_vm1 = vmmov 0   ;;  %v1762_v16 = vld [vmem:[%s2413_s3] sm:$0xff]   ;;  %1618 = vmatprep.subr.bf16.mxu1 %v1969_v15  ;;  %s1971_s27 = smov 112  }
  0x43   :  { %110 = vadd.xlane.f32.xlu0 %v109_v2  ;;  %1614 = vmatprep.mubr.msk.bf16.mxu0 %vm1970_vm1, %v1969_v15  ;;  %v1514_v25 = vld [vmem:[%s2411_s1] ss:$0 sm:$0xff]  ;;  %s1972_s1 = smov 120   ;;  %s1973_s29 = smov 104   ;;  %vm255_vm2 = vcmask 64512   ;;  %vm764_vm4 = vcmask 1043456  }
  0x44   :  { %1611 = vmatpush3.bf16.msra.mxu0 %v1761_v14  ;;  %1620 = vmatprep.mubr.msk.bf16.mxu1 %vm1970_vm1, %v1969_v15  ;;  %v1515_v29 = vld [vmem:[%s2412_s2] ss:$0 sm:$0xff]  ;;  %s1974_s2 = smov 96   ;;  %vm1152_vm5 = vcmask 60416   ;;  %s1976_s8 = smov 16   ;;  %vm1160_vm6 = vcmask 126016  }
  0x45   :  { %1612 = vmatprep.subr.bf16.mxu0 %v1969_v15  ;;  %s1977_s28 = smov 24   ;;  %vm1168_vm7 = vcmask 191616   ;;  %vm1176_vm8 = vcmask 257216   ;;  %vm1430_vm9 = vcmask 523264   ;;  %s1978_s0 = smov [#allocation13]  }
  0x46   :  { %s1496_s9 = sshll.u32 %s1978_s0, 4  ;;  %s1497_s9 = int_to_ptr.vmem [resolvable:$true] %s1496_s9 }
  0x47   :  { %113 = vadd.xlane.f32.xlu0 %v112_v3  ;;  %s1912_s23 = scalar_lea.vmem %s1497_s9, 1024  ;;  %p1917_p12 = scmp.lt.s32.totalorder %s1497_s9, %s1497_s9 }
  0x48   :  { %1613 = vmatpush3.bf16.msra.mxu0 %v1762_v16  ;;  %p1913_p11 = scmp.ne.s32.totalorder %s1497_s9, %s1912_s23  ;;  %p1918_p13 = scmp.lt.s32.totalorder %s1912_s23, %s1912_s23 }
  0x49   :  { %1624 = vmatprep.subr.bf16.mxu0 %v1969_v15 }
  0x4a   :  { %p1919_p0 = por %p1918_p13, %p1917_p12 }
  0x4c   :  { %p1920_p1 = pnand %p1919_p0, %p1913_p11 }
  0xcc   :  { %v111_v4 = vpop.xlane.xlu0 %110 }
  0xcd   :  { %v116_v5 = vmul.f32 0.03125, %v111_v4 }
  0xcf   :  { %v118_v6 = vsub.f32 %v2071_v0, %v116_v5 }
  0xd0   :  { %v114_v7 = vpop.xlane.xlu0 %113 }
  0xd1   :  { %v117_v8 = vmul.f32 0.03125, %v114_v7  ;;  %v120_v9 = vmul.f32 %v118_v6, %v118_v6 }
  0xd3   :  { %v119_v10 = vsub.f32 %v2076_v1, %v117_v8  ;;  %v122_v11 = vsel %vm108_vm0, %v120_v9, 0.0 }
  0xd4   :  { %123 = vadd.xlane.f32.xlu1 %v122_v11 }
  0xd5   :  { %v121_v12 = vmul.f32 %v119_v10, %v119_v10 }
  0xd7   :  { %v125_v13 = vsel %vm108_vm0, %v121_v12, 0.0 }
  0xd8   :  { %126 = vadd.xlane.f32.xlu1 %v125_v13 }
 0x15d   :  { %v124_v17 = vpop.xlane.xlu1 %123 }
 0x15e   :  { %v128_v18 = vmul.f32 0.03125, %v124_v17 }
 0x160   :  { %v130_v19 = vadd.f32 1e-05, %v128_v18 }
 0x161   :  { %v127_v20 = vpop.xlane.xlu1 %126 }
 0x162   :  { %1772 = vrsqrt.f32 %v130_v19  ;;  %v129_v21 = vmul.f32 0.03125, %v127_v20 }
 0x164   :  { %v131_v22 = vadd.f32 1e-05, %v129_v21 }
 0x166   :  { %1774 = vrsqrt.f32 %v131_v22 }
 0x16f   :  { %v1773_v23 = vpop.eup %1772 }
 0x170   :  { %v134_v24 = vmul.f32 %v1773_v23, %v118_v6  ;;  %v243_v6 = vlaneseq }
 0x172   :  { %v143_v28 = vmul.f32 %v1514_v25, %v134_v24  ;;  %v244_v7 = vshrl.u32 %v243_v6, 7  ;;  %v246_v8 = vand.u32 127, %v243_v6 }
 0x173   :  { %v1775_v26 = vpop.eup %1774 }
 0x174   :  { %v135_v27 = vmul.f32 %v1775_v26, %v119_v10  ;;  %v152_v31 = vadd.f32 %v1515_v29, %v143_v28  ;;  %v248_v9 = vsub.s32 %v246_v8, %v244_v7  ;;  %vm2181_vm3 = vcmp.le.s32.totalorder %v246_v8, %v244_v7 }
 0x176   :  { %v144_v30 = vmul.f32 %v1514_v25, %v135_v27  ;;  %v249_v10 = vcvt.s32.f32 %v248_v9 }
 0x178   :  { %v153_v32 = vadd.f32 %v1515_v29, %v144_v30  ;;  %v250_v11 = vmul.f32 0.17677669, %v249_v10 }
 0x17a   :  { %v154_v33 = vpack.c.bf16 %v153_v32, %v152_v31  ;;  %v2187_v13 = vsel %vm2181_vm3, %v250_v11, 0.0 }
 0x17c   :  { %1615 = vmatmul.mubr.msk.bf16.vlgmr.msra.gmra.mxu0 %vm108_vm0, %v154_v33 }
 0x17d   :  { %1626 = vmatprep.mubr.msk.bf16.mxu0 %vm1970_vm1, %v1969_v15 }
 0x23c   :  { %v208_v34 = vpop.f32.mrf.mxu0 }
 0x23d   :  { %219 = vrot.lane.b32.xlu1 %v208_v34, %s1971_s27  ;;  %216 = vrot.lane.b32.xlu0 %v208_v34, %s1972_s1  ;;  %v2109_v38 = vpack.c.bf16 %v208_v34, %v208_v34 }
 0x23e   :  { %v1616_v35 = vpop.f32.mrf.mxu0 }
 0x240   :  { %v211_v36 = vpop.f32.mrf.mxu0 }
 0x241   :  { %222 = vrot.lane.b32.xlu1 %v208_v34, %s1973_s29  ;;  %229 = vrot.lane.b32.xlu0 %v211_v36, %s1971_s27  ;;  %v2120_v46 = vpack.c.bf16 %v211_v36, %v211_v36 }
 0x242   :  { %v1617_v37 = vpop.f32.mrf.mxu0 }
 0x245   :  { %253 = vrot.lane.b32.xlu0 %v2109_v38, %s1974_s2  ;;  %226 = vrot.lane.b32.xlu1 %v211_v36, %s1972_s1 }
 0x249   :  { %232 = vrot.lane.b32.xlu1 %v211_v36, %s1973_s29 }
 0x2af   :  { %v220_v39 = vpop.permute.xlu1 %219  ;;  %v217_v40 = vpop.permute.xlu0 %216 }
 0x2b0   :  { %v2112_v41 = vpack.c.bf16 %v220_v39, %v220_v39  ;;  %v2114_v42 = vpack.c.bf16 %v217_v40, %v217_v40 }
 0x2b2   :  { %352 = vrot.lane.b32.xlu0 %v2112_v41, %s1974_s2  ;;  %303 = vrot.lane.b32.xlu1 %v2114_v42, %s1974_s2 }
 0x2b3   :  { %v223_v43 = vpop.permute.xlu1 %222  ;;  %v230_v44 = vpop.permute.xlu0 %229 }
 0x2b4   :  { %v2118_v45 = vpack.c.bf16 %v223_v43, %v223_v43  ;;  %v2124_v49 = vpack.c.bf16 %v230_v44, %v230_v44 }
 0x2b6   :  { %401 = vrot.lane.b32.xlu1 %v2118_v45, %s1974_s2  ;;  %450 = vrot.lane.b32.xlu0 %v2120_v46, %s1974_s2 }
 0x2b7   :  { %v254_v47 = vpop.permute.xlu0 %253  ;;  %v227_v48 = vpop.permute.xlu1 %226 }
 0x2b8   :  { %v2126_v50 = vpack.c.bf16 %v227_v48, %v227_v48  ;;  %v260_v51 = vsel %vm255_vm2, %v254_v47, 0 }
 0x2b9   :  { %1619 = vmatpush3.bf16.xpose.msra.mxu1 %v260_v51 }
 0x2ba   :  { %499 = vrot.lane.b32.xlu1 %v2126_v50, %s1974_s2  ;;  %548 = vrot.lane.b32.xlu0 %v2124_v49, %s1974_s2 }
 0x2bb   :  { %v233_v52 = vpop.permute.xlu1 %232  ;;  %1630 = vmatprep.subr.bf16.mxu1 %v1969_v15 }
 0x2bc   :  { %v2132_v53 = vpack.c.bf16 %v233_v52, %v233_v52 }
 0x2be   :  { %597 = vrot.lane.b32.xlu1 %v2132_v53, %s1974_s2 }
 0x2c0   :  { %1621 = vmatmul.mubr.msk.bf16.vlgmr.msra.gmra.mxu1 %vm255_vm2, %v2109_v38 }
 0x2c1   :  { %1632 = vmatprep.mubr.msk.bf16.mxu1 %vm1970_vm1, %v1969_v15 }
 0x324   :  { %v353_v54 = vpop.permute.xlu0 %352  ;;  %v304_v55 = vpop.permute.xlu1 %303 }
 0x325   :  { %v358_v56 = vsel %vm255_vm2, %v353_v54, 0  ;;  %v309_v57 = vsel %vm255_vm2, %v304_v55, 0 }
 0x326   :  { %1625 = vmatpush3.bf16.xpose.msra.mxu0 %v309_v57  ;;  %1631 = vmatpush3.bf16.xpose.msra.mxu1 %v358_v56 }
 0x327   :  { %1636 = vmatprep.subr.bf16.mxu0 %v1969_v15  ;;  %1642 = vmatprep.subr.bf16.mxu1 %v1969_v15 }
 0x328   :  { %v402_v58 = vpop.permute.xlu1 %401  ;;  %v451_v59 = vpop.permute.xlu0 %450 }
 0x329   :  { %v407_v60 = vsel %vm255_vm2, %v402_v58, 0  ;;  %v456_v61 = vsel %vm255_vm2, %v451_v59, 0 }
 0x32c   :  { %v500_v62 = vpop.permute.xlu1 %499  ;;  %v549_v63 = vpop.permute.xlu0 %548 }
 0x32d   :  { %1627 = vmatmul.mubr.msk.bf16.vlgmr.msra.gmra.mxu0 %vm255_vm2, %v2114_v42  ;;  %1633 = vmatmul.mubr.msk.bf16.vlgmr.msra.gmra.mxu1 %vm255_vm2, %v2112_v41  ;;  %v505_v2 = vsel %vm255_vm2, %v500_v62, 0  ;;  %v554_v3 = vsel %vm255_vm2, %v549_v63, 0 }
 0x32e   :  { %1637 = vmatpush3.bf16.xpose.msra.mxu0 %v407_v60  ;;  %1643 = vmatpush3.bf16.xpose.msra.mxu1 %v456_v61 }
 0x32f   :  { %1638 = vmatprep.mubr.msk.bf16.mxu0 %vm1970_vm1, %v1969_v15  ;;  %1644 = vmatprep.mubr.msk.bf16.mxu1 %vm1970_vm1, %v1969_v15 }
 0x330   :  { %1648 = vmatprep.subr.bf16.mxu0 %v1969_v15  ;;  %1654 = vmatprep.subr.bf16.mxu1 %v1969_v15  ;;  %v598_v4 = vpop.permute.xlu1 %597 }
 0x331   :  { %v603_v5 = vsel %vm255_vm2, %v598_v4, 0 }
 0x335   :  { %1639 = vmatmul.mubr.msk.bf16.vlgmr.msra.gmra.mxu0 %vm255_vm2, %v2118_v45  ;;  %1645 = vmatmul.mubr.msk.bf16.vlgmr.msra.gmra.mxu1 %vm255_vm2, %v2120_v46 }
 0x336   :  { %1649 = vmatpush3.bf16.xpose.msra.mxu0 %v505_v2  ;;  %1655 = vmatpush3.bf16.xpose.msra.mxu1 %v554_v3 }
 0x337   :  { %1650 = vmatprep.mubr.msk.bf16.mxu0 %vm1970_vm1, %v1969_v15  ;;  %1656 = vmatprep.mubr.msk.bf16.mxu1 %vm1970_vm1, %v1969_v15 }
 0x338   :  { %1660 = vmatprep.subr.bf16.mxu0 %v1969_v15  ;;  %1666 = vmatprep.subr.bf16.mxu1 %v1969_v15 }
 0x33d   :  { %1651 = vmatmul.mubr.msk.bf16.vlgmr.msra.gmra.mxu0 %vm255_vm2, %v2126_v50  ;;  %1657 = vmatmul.mubr.msk.bf16.vlgmr.msra.gmra.mxu1 %vm255_vm2, %v2124_v49 }
 0x33e   :  { %1661 = vmatpush3.bf16.xpose.msra.mxu0 %v603_v5  ;;  %1662 = vmatprep.mubr.msk.bf16.mxu0 %vm1970_vm1, %v1969_v15 }
 0x33f   :  { %1672 = vmatprep.subr.bf16.mxu0 %v1969_v15  ;;  %1668 = vmatprep.mubr.msk.bf16.mxu1 %vm1970_vm1, %v1969_v15 }
 0x345   :  { %1663 = vmatmul.mubr.msk.bf16.vlgmr.msra.gmra.mxu0 %vm255_vm2, %v2132_v53 }
 0x346   :  { %1674 = vmatprep.mubr.msk.bf16.mxu0 %vm1970_vm1, %v1969_v15 }
 0x380   :  { %v296_v14 = vpop.f32.mrf.mxu1 }
 0x381   :  { %v297_v16 = vadd.f32 %v296_v14, %v2187_v13 }
 0x382   :  { %v1622_v17 = vpop.f32.mrf.mxu1 }
 0x383   :  { %v647_v18 = vsel %vm2181_vm3, %v297_v16, -1e+30 }
 0x384   :  { %v299_v19 = vpop.f32.mrf.mxu1  ;;  %v655_v20 = vsel %vm255_vm2, %v647_v18, -inf }
 0x385   :  { %656 = vmax.xlane.f32.xlu0 %v655_v20 }
 0x386   :  { %v1623_v21 = vpop.f32.mrf.mxu1 }
 0x3ed   :  { %v345_v22 = vpop.f32.mrf.mxu0  ;;  %v394_v23 = vpop.f32.mrf.mxu1 }
 0x3ee   :  { %v346_v24 = vadd.f32 %v345_v22, %v2187_v13  ;;  %v395_v25 = vadd.f32 %v394_v23, %v2187_v13 }
 0x3ef   :  { %v1628_v26 = vpop.f32.mrf.mxu0  ;;  %v1634_v27 = vpop.f32.mrf.mxu1 }
 0x3f0   :  { %v2197_v28 = vsel %vm2181_vm3, %v395_v25, -1e+30  ;;  %v2201_v29 = vsel %vm2181_vm3, %v346_v24, -1e+30 }
 0x3f1   :  { %v348_v30 = vpop.f32.mrf.mxu0  ;;  %v397_v31 = vpop.f32.mrf.mxu1  ;;  %v661_v32 = vsel %vm255_vm2, %v2197_v28, -inf  ;;  %v658_v33 = vsel %vm255_vm2, %v2201_v29, -inf }
 0x3f2   :  { %662 = vmax.xlane.f32.xlu0 %v661_v32  ;;  %659 = vmax.xlane.f32.xlu1 %v658_v33 }
 0x3f3   :  { %v1629_v34 = vpop.f32.mrf.mxu0  ;;  %v1635_v35 = vpop.f32.mrf.mxu1 }
 0x3f5   :  { %v443_v36 = vpop.f32.mrf.mxu0  ;;  %v492_v37 = vpop.f32.mrf.mxu1 }
 0x3f6   :  { %v444_v39 = vadd.f32 %v443_v36, %v2187_v13  ;;  %v493_v40 = vadd.f32 %v492_v37, %v2187_v13 }
 0x3f7   :  { %v1640_v43 = vpop.f32.mrf.mxu0  ;;  %v1646_v44 = vpop.f32.mrf.mxu1 }
 0x3f8   :  { %v2211_v47 = vsel %vm2181_vm3, %v444_v39, -1e+30  ;;  %v2217_v54 = vsel %vm2181_vm3, %v493_v40, -1e+30 }
 0x3f9   :  { %v446_v48 = vpop.f32.mrf.mxu0  ;;  %v495_v51 = vpop.f32.mrf.mxu1  ;;  %v664_v52 = vsel %vm255_vm2, %v2211_v47, -inf  ;;  %v667_v59 = vsel %vm255_vm2, %v2217_v54, -inf }
 0x3fa   :  { %665 = vmax.xlane.f32.xlu0 %v664_v52 }
 0x3fb   :  { %v1641_v55 = vpop.f32.mrf.mxu0  ;;  %v1647_v56 = vpop.f32.mrf.mxu1 }
 0x3fd   :  { %v541_v57 = vpop.f32.mrf.mxu0  ;;  %v590_v58 = vpop.f32.mrf.mxu1 }
 0x3fe   :  { %v542_v60 = vadd.f32 %v541_v57, %v2187_v13  ;;  %v591_v61 = vadd.f32 %v590_v58, %v2187_v13  ;;  %668 = vmax.xlane.f32.xlu0 %v667_v59 }
 0x3ff   :  { %v1652_v62 = vpop.f32.mrf.mxu0  ;;  %v1658_v63 = vpop.f32.mrf.mxu1 }
 0x400   :  { %v2225_v2 = vsel %vm2181_vm3, %v591_v61, -1e+30  ;;  %v2229_v3 = vsel %vm2181_vm3, %v542_v60, -1e+30 }
 0x401   :  { %v544_v4 = vpop.f32.mrf.mxu0  ;;  %v593_v5 = vpop.f32.mrf.mxu1  ;;  %v673_v6 = vsel %vm255_vm2, %v2225_v2, -inf  ;;  %v670_v7 = vsel %vm255_vm2, %v2229_v3, -inf }
 0x402   :  { %674 = vmax.xlane.f32.xlu0 %v673_v6  ;;  %671 = vmax.xlane.f32.xlu1 %v670_v7 }
 0x403   :  { %v1653_v8 = vpop.f32.mrf.mxu0  ;;  %v1659_v9 = vpop.f32.mrf.mxu1 }
 0x405   :  { %v639_v10 = vpop.f32.mrf.mxu0 }
 0x406   :  { %v640_v22 = vadd.f32 %v639_v10, %v2187_v13 }
 0x407   :  { %v1664_v11 = vpop.f32.mrf.mxu0 }
 0x409   :  { %v642_v14 = vpop.f32.mrf.mxu0 }
 0x40b   :  { %v1665_v16 = vpop.f32.mrf.mxu0 }
 0x40e   :  { %v657_v17 = vpop.xlane.xlu0 %656 }
 0x40f   :  { %v679_v19 = vsub.f32 %v647_v18, %v657_v17 }
 0x411   :  { %v687_v20 = vmul.f32 1.442695, %v679_v19 }
 0x413   :  { %808 = vrot.lane.b32.xlu1 %v2114_v42, %s1964_s17  ;;  %1776 = vpow2.f32 %v687_v20  ;;  %v654_v42 = vsel %vm2181_vm3, %v640_v22, -1e+30 }
 0x417   :  { %856 = vrot.lane.b32.xlu1 %v2112_v41, %s1964_s17  ;;  %v676_v41 = vsel %vm255_vm2, %v654_v42, -inf }
 0x418   :  { %759 = vrot.lane.b32.xlu0 %v2109_v38, %s1964_s17 }
 0x420   :  { %v2241_v21 = vpop.eup %1776 }
 0x421   :  { %v703_v23 = vsel %vm255_vm2, %v2241_v21, 0.0 }
 0x437   :  { %704 = vadd.xlane.f32.xlu0 %v703_v23 }
 0x43b   :  { %677 = vmax.xlane.f32.xlu1 %v676_v41 }
 0x44c   :  { %904 = vrot.lane.b32.xlu1 %v2118_v45, %s1964_s17 }
 0x47b   :  { %v663_v38 = vpop.xlane.xlu0 %662  ;;  %v660_v18 = vpop.xlane.xlu1 %659 }
 0x47c   :  { %v681_v24 = vsub.f32 %v2197_v28, %v663_v38  ;;  %v680_v25 = vsub.f32 %v2201_v29, %v660_v18 }
 0x47e   :  { %v691_v13 = vmul.f32 1.442695, %v681_v24  ;;  %v689_v26 = vmul.f32 1.442695, %v680_v25 }
 0x480   :  { %1778 = vpow2.f32 %v691_v13 }
 0x481   :  { %1780 = vpow2.f32 %v689_v26 }
 0x483   :  { %v666_v27 = vpop.xlane.xlu0 %665 }
 0x484   :  { %v682_v39 = vsub.f32 %v2211_v47, %v666_v27 }
 0x486   :  { %v693_v44 = vmul.f32 1.442695, %v682_v39 }
 0x487   :  { %v669_v30 = vpop.xlane.xlu0 %668 }
 0x488   :  { %v683_v37 = vsub.f32 %v2217_v54, %v669_v30 }
 0x48a   :  { %v695_v40 = vmul.f32 1.442695, %v683_v37 }
 0x48b   :  { %v675_v12 = vpop.xlane.xlu0 %674  ;;  %v672_v31 = vpop.xlane.xlu1 %671 }
 0x48c   :  { %v685_v43 = vsub.f32 %v2225_v2, %v675_v12  ;;  %v684_v48 = vsub.f32 %v2229_v3, %v672_v31  ;;  %1782 = vpow2.f32 %v695_v40 }
 0x48d   :  { %v2253_v32 = vpop.eup %1778  ;;  %1784 = vpow2.f32 %v693_v44 }
 0x48e   :  { %v2255_v33 = vpop.eup %1780  ;;  %v709_v45 = vsel %vm255_vm2, %v2253_v32, 0.0  ;;  %v699_v51 = vmul.f32 1.442695, %v685_v43  ;;  %v697_v52 = vmul.f32 1.442695, %v684_v48 }
 0x48f   :  { %710 = vadd.xlane.f32.xlu0 %v709_v45  ;;  %v760_v28 = vpop.permute.xlu0 %759  ;;  %v809_v34 = vpop.permute.xlu1 %808  ;;  %v706_v29 = vsel %vm255_vm2, %v2255_v33, 0.0 }
 0x490   :  { %v766_v35 = vsel %vm764_vm4, %v760_v28, 0  ;;  %v814_v36 = vsel %vm764_vm4, %v809_v34, 0  ;;  %707 = vadd.xlane.f32.xlu1 %v706_v29  ;;  %1786 = vpow2.f32 %v699_v51 }
 0x491   :  { %1667 = vmatpush3.bf16.msra.mxu1 %v766_v35  ;;  %1673 = vmatpush3.bf16.msra.mxu0 %v814_v36  ;;  %1788 = vpow2.f32 %v697_v52 }
 0x492   :  { %1678 = vmatprep.subr.bf16.mxu1 %v1969_v15  ;;  %1684 = vmatprep.subr.bf16.mxu0 %v1969_v15 }
 0x493   :  { %v857_v55 = vpop.permute.xlu1 %856 }
 0x494   :  { %v862_v5 = vsel %vm764_vm4, %v857_v55, 0 }
 0x4a1   :  { %1000 = vrot.lane.b32.xlu1 %v2126_v50, %s1964_s17  ;;  %v2273_v50 = vpop.eup %1782 }
 0x4a2   :  { %v2275_v56 = vpop.eup %1784  ;;  %v715_v47 = vsel %vm255_vm2, %v2273_v50, 0.0 }
 0x4a3   :  { %v2279_v54 = vpop.eup %1786  ;;  %v712_v57 = vsel %vm255_vm2, %v2275_v56, 0.0 }
 0x4a4   :  { %v2283_v59 = vpop.eup %1788  ;;  %v721_v62 = vsel %vm255_vm2, %v2279_v54, 0.0 }
 0x4a5   :  { %952 = vrot.lane.b32.xlu0 %v2120_v46, %s1964_s17  ;;  %v718_v63 = vsel %vm255_vm2, %v2283_v59, 0.0 }
 0x4c0   :  { %v705_v46 = vpop.xlane.xlu0 %704 }
 0x4c1   :  { %1790 = vrcp.f32 %v705_v46 }
 0x4c4   :  { %716 = vadd.xlane.f32.xlu0 %v715_v47  ;;  %v678_v58 = vpop.xlane.xlu1 %677 }
 0x4c5   :  { %713 = vadd.xlane.f32.xlu1 %v712_v57  ;;  %v686_v60 = vsub.f32 %v654_v42, %v678_v58 }
 0x4c7   :  { %v701_v61 = vmul.f32 1.442695, %v686_v60 }
 0x4c8   :  { %722 = vadd.xlane.f32.xlu0 %v721_v62  ;;  %v905_v8 = vpop.permute.xlu1 %904 }
 0x4c9   :  { %1792 = vpow2.f32 %v701_v61  ;;  %719 = vadd.xlane.f32.xlu1 %v718_v63 }
 0x4ce   :  { %v1791_v2 = vpop.eup %1790 }
 0x4cf   :  { %v728_v3 = vmul.f32 %v1791_v2, %v2241_v21  ;;  %v910_v21 = vsel %vm764_vm4, %v905_v8, 0 }
 0x4d1   :  { %743 = vst.msk [vmem:[#allocation13] sm:$0xff] %vm255_vm2, %v728_v3  ;;  %v751_v4 = vpack.c.bf16 %v728_v3, %v728_v3 }
 0x4d3   :  { %1669 = vmatmul.mubr.msk.bf16.vlgmr.msra.gmra.mxu1 %vm255_vm2, %v751_v4 }
 0x4d4   :  { %1679 = vmatpush3.bf16.msra.mxu1 %v862_v5  ;;  %1680 = vmatprep.mubr.msk.bf16.mxu1 %vm1970_vm1, %v1969_v15 }
 0x4d5   :  { %1690 = vmatprep.subr.bf16.mxu1 %v1969_v15 }
 0x4d6   :  { %v2296_v6 = vpop.eup %1792 }
 0x4d7   :  { %v724_v7 = vsel %vm255_vm2, %v2296_v6, 0.0 }
 0x4d8   :  { %725 = vadd.xlane.f32.xlu1 %v724_v7 }
 0x4de   :  { %1048 = vrot.lane.b32.xlu0 %v2124_v49, %s1964_s17 }
 0x4e9   :  { %1096 = vrot.lane.b32.xlu1 %v2132_v53, %s1964_s17  ;;  %s1975_s17 = smov 8  }
 0x518   :  { %v711_v9 = vpop.xlane.xlu0 %710 }
 0x519   :  { %1794 = vrcp.f32 %v711_v9  ;;  %v708_v10 = vpop.xlane.xlu1 %707 }
 0x51a   :  { %1796 = vrcp.f32 %v708_v10 }
 0x51c   :  { %v953_v17 = vpop.permute.xlu0 %952 }
 0x51d   :  { %v958_v53 = vsel %vm764_vm4, %v953_v17, 0  ;;  %v1001_v22 = vpop.permute.xlu1 %1000  ;;  %v1763_v17 = vld [vmem:[%s2414_s4 + $0x8] sm:$0xff]  }
 0x51e   :  { %v1006_v45 = vsel %vm764_vm4, %v1001_v22, 0 }
 0x526   :  { %v1795_v11 = vpop.eup %1794 }
 0x527   :  { %v1797_v14 = vpop.eup %1796  ;;  %v732_v16 = vmul.f32 %v1795_v11, %v2253_v32 }
 0x528   :  { %v730_v19 = vmul.f32 %v1797_v14, %v2255_v33 }
 0x529   :  { %745 = vst.msk [vmem:[#allocation13 + $0x10] sm:$0xff] %vm255_vm2, %v732_v16  ;;  %v753_v20 = vpack.c.bf16 %v732_v16, %v732_v16 }
 0x52a   :  { %744 = vst.msk [vmem:[#allocation13 + $0x8] sm:$0xff] %vm255_vm2, %v730_v19  ;;  %v752_v49 = vpack.c.bf16 %v730_v19, %v730_v19 }
 0x52b   :  { %1681 = vmatmul.mubr.msk.bf16.vlgmr.msra.gmra.mxu1 %vm255_vm2, %v753_v20 }
 0x52c   :  { %1675 = vmatmul.mubr.msk.bf16.vlgmr.msra.gmra.mxu0 %vm255_vm2, %v752_v49  ;;  %1691 = vmatpush3.bf16.msra.mxu1 %v958_v53  ;;  %v1764_v49 = vld [vmem:[%s2414_s4] sm:$0xff]  }
 0x52d   :  { %1685 = vmatpush3.bf16.msra.mxu0 %v910_v21  ;;  %1686 = vmatprep.mubr.msk.bf16.mxu0 %vm1970_vm1, %v1969_v15 }
 0x52e   :  { %1692 = vmatprep.mubr.msk.bf16.mxu1 %vm1970_vm1, %v1969_v15  ;;  %1696 = vmatprep.subr.bf16.mxu0 %v1969_v15 }
 0x52f   :  { %1702 = vmatprep.subr.bf16.mxu1 %v1969_v15 }
 0x54d   :  { %v717_v23 = vpop.xlane.xlu0 %716 }
 0x54e   :  { %1798 = vrcp.f32 %v717_v23  ;;  %v714_v42 = vpop.xlane.xlu1 %713 }
 0x54f   :  { %1800 = vrcp.f32 %v714_v42 }
 0x551   :  { %v723_v41 = vpop.xlane.xlu0 %722 }
 0x552   :  { %1802 = vrcp.f32 %v723_v41  ;;  %v720_v38 = vpop.xlane.xlu1 %719 }
 0x553   :  { %1804 = vrcp.f32 %v720_v38 }
 0x555   :  { %v1049_v13 = vpop.permute.xlu0 %1048 }
 0x556   :  { %v1054_v32 = vsel %vm764_vm4, %v1049_v13, 0 }
 0x55b   :  { %v1799_v18 = vpop.eup %1798 }
 0x55c   :  { %v1801_v24 = vpop.eup %1800  ;;  %v736_v25 = vmul.f32 %v1799_v18, %v2273_v50 }
 0x55d   :  { %v734_v26 = vmul.f32 %v1801_v24, %v2275_v56 }
 0x55e   :  { %747 = vst.msk [vmem:[#allocation13 + $0x20] sm:$0xff] %vm255_vm2, %v736_v25  ;;  %v755_v27 = vpack.c.bf16 %v736_v25, %v736_v25 }
 0x55f   :  { %v1803_v30 = vpop.eup %1802  ;;  %746 = vst.msk [vmem:[#allocation13 + $0x18] sm:$0xff] %vm255_vm2, %v734_v26  ;;  %v754_v12 = vpack.c.bf16 %v734_v26, %v734_v26 }
 0x560   :  { %v1805_v31 = vpop.eup %1804  ;;  %1693 = vmatmul.mubr.msk.bf16.vlgmr.msra.gmra.mxu1 %vm255_vm2, %v755_v27  ;;  %v740_v33 = vmul.f32 %v1803_v30, %v2279_v54 }
 0x561   :  { %1687 = vmatmul.mubr.msk.bf16.vlgmr.msra.gmra.mxu0 %vm255_vm2, %v754_v12  ;;  %1703 = vmatpush3.bf16.msra.mxu1 %v1054_v32  ;;  %v726_v28 = vpop.xlane.xlu1 %725  ;;  %v738_v34 = vmul.f32 %v1805_v31, %v2283_v59  ;;  %v1541_v32 = vld [vmem:[#allocation3] ss:$0 sm:$0xff] }
 0x562   :  { %1697 = vmatpush3.bf16.msra.mxu0 %v1006_v45  ;;  %1806 = vrcp.f32 %v726_v28  ;;  %1698 = vmatprep.mubr.msk.bf16.mxu0 %vm1970_vm1, %v1969_v15  ;;  %749 = vst.msk [vmem:[#allocation13 + $0x30] sm:$0xff] %vm255_vm2, %v740_v33  ;;  %v757_v35 = vpack.c.bf16 %v740_v33, %v740_v33 }
 0x563   :  { %1704 = vmatprep.mubr.msk.bf16.mxu1 %vm1970_vm1, %v1969_v15  ;;  %1708 = vmatprep.subr.bf16.mxu0 %v1969_v15  ;;  %748 = vst.msk [vmem:[#allocation13 + $0x28] sm:$0xff] %vm255_vm2, %v738_v34  ;;  %v756_v37 = vpack.c.bf16 %v738_v34, %v738_v34 }
 0x564   :  { %1714 = vmatprep.subr.bf16.mxu1 %v1969_v15 }
 0x565   :  { %v1097_v29 = vpop.permute.xlu1 %1096 }
 0x566   :  { %v1102_v36 = vsel %vm764_vm4, %v1097_v29, 0 }
 0x568   :  { %1705 = vmatmul.mubr.msk.bf16.vlgmr.msra.gmra.mxu1 %vm255_vm2, %v757_v35 }
 0x569   :  { %1699 = vmatmul.mubr.msk.bf16.vlgmr.msra.gmra.mxu0 %vm255_vm2, %v756_v37  ;;  %1718 = vmatprep.mubr.msk.bf16.mxu1 %vm1970_vm1, %v1969_v15 }
 0x56a   :  { %1709 = vmatpush3.bf16.msra.mxu0 %v1102_v36  ;;  %1710 = vmatprep.mubr.msk.bf16.mxu0 %vm1970_vm1, %v1969_v15 }
 0x56b   :  { %1722 = vmatprep.subr.bf16.mxu0 %v1969_v15  ;;  %1715 = vmatpush3.bf16.msra.mxu1 %v1763_v17  ;;  %v1771_v17 = vld [vmem:[%s2420_s10] sm:$0xff]  }
 0x56c   :  { %1716 = vmatprep.subr.bf16.mxu1 %v1969_v15 }
 0x56f   :  { %v1807_v39 = vpop.eup %1806  ;;  %1717 = vmatpush3.bf16.msra.mxu1 %v1764_v49 }
 0x570   :  { %v742_v40 = vmul.f32 %v1807_v39, %v2296_v6  ;;  %1730 = vmatprep.subr.bf16.mxu1 %v1969_v15 }
 0x572   :  { %750 = vst.msk [vmem:[#allocation13 + $0x38] sm:$0xff] %vm255_vm2, %v742_v40  ;;  %v758_v43 = vpack.c.bf16 %v742_v40, %v742_v40 }
 0x574   :  { %1711 = vmatmul.mubr.msk.bf16.vlgmr.msra.gmra.mxu0 %vm255_vm2, %v758_v43 }
 0x575   :  { %1726 = vmatprep.mubr.msk.bf16.mxu0 %vm1970_vm1, %v1969_v15 }
 0x593   :  { %v802_v44 = vpop.f32.mrf.mxu1 }
 0x594   :  { %v1144_v48 = vpack.c.bf16 %v802_v44, %v802_v44 }
 0x595   :  { %v1670_v51 = vpop.f32.mrf.mxu1 }
 0x596   :  { %1153 = vst.msk [vmem:[#allocation2] sm:$0xf] %vm1152_vm5, %v1144_v48 }
 0x597   :  { %v805_v52 = vpop.f32.mrf.mxu1 }
 0x599   :  { %v1671_v50 = vpop.f32.mrf.mxu1 }
 0x5eb   :  { %v898_v55 = vpop.f32.mrf.mxu1 }
 0x5ec   :  { %v850_v46 = vpop.f32.mrf.mxu0  ;;  %v1559_v59 = vpack.c.bf16 %v898_v55, %v898_v55 }
 0x5ed   :  { %v1558_v56 = vpack.c.bf16 %v850_v46, %v850_v46  ;;  %v1682_v47 = vpop.f32.mrf.mxu1 }
 0x5ee   :  { %v1676_v54 = vpop.f32.mrf.mxu0  ;;  %v1767_v47 = vld [vmem:[#allocation9] sm:$0xff]  }
 0x5ef   :  { %1157 = vrot.lane.b32.xlu0 %v1558_v56, %s1975_s17  ;;  %v901_v57 = vpop.f32.mrf.mxu1  ;;  %v1766_v56 = vld [vmem:[#allocation9 + $0x8] sm:$0xff]  }
 0x5f0   :  { %v853_v58 = vpop.f32.mrf.mxu0  ;;  %1723 = vmatpush3.bf16.msra.mxu0 %v1766_v56  ;;  %v1768_v54 = vld [vmem:[%s2420_s10 + $0x18] sm:$0xff]  }
 0x5f1   :  { %v1683_v60 = vpop.f32.mrf.mxu1  ;;  %1724 = vmatprep.subr.bf16.mxu0 %v1969_v15 }
 0x5f2   :  { %v1677_v61 = vpop.f32.mrf.mxu0 }
 0x5f3   :  { %1165 = vrot.lane.b32.xlu0 %v1559_v59, %s1976_s8 }
 0x5f4   :  { %1725 = vmatpush3.bf16.msra.mxu0 %v1767_v47 }
 0x620   :  { %v994_v62 = vpop.f32.mrf.mxu1 }
 0x621   :  { %v946_v63 = vpop.f32.mrf.mxu0  ;;  %v1148_v2 = vpack.c.bf16 %v994_v62, %v994_v62 }
 0x622   :  { %v1560_v3 = vpack.c.bf16 %v946_v63, %v946_v63  ;;  %v1694_v4 = vpop.f32.mrf.mxu1 }
 0x623   :  { %1178 = vst.msk [vmem:[#allocation2 + $0x4] sm:$0xf] %vm1152_vm5, %v1148_v2  ;;  %v1688_v5 = vpop.f32.mrf.mxu0 }
 0x624   :  { %1173 = vrot.lane.b32.xlu0 %v1560_v3, %s1977_s28  ;;  %v997_v6 = vpop.f32.mrf.mxu1  ;;  %v1546_v3 = vld [vmem:[#allocation6] ss:$0 sm:$0xff] }
 0x625   :  { %v949_v7 = vpop.f32.mrf.mxu0 }
 0x626   :  { %v1695_v8 = vpop.f32.mrf.mxu1  ;;  %v1547_v7 = vld [vmem:[#allocation8] ss:$0 sm:$0xff] }
 0x627   :  { %v1689_v9 = vpop.f32.mrf.mxu0 }
 0x628   :  { %v1090_v10 = vpop.f32.mrf.mxu1 }
 0x629   :  { %v1042_v11 = vpop.f32.mrf.mxu0  ;;  %v1562_v21 = vpack.c.bf16 %v1090_v10, %v1090_v10 }
 0x62a   :  { %v1561_v14 = vpack.c.bf16 %v1042_v11, %v1042_v11  ;;  %v1706_v16 = vpop.f32.mrf.mxu1 }
 0x62b   :  { %v1700_v19 = vpop.f32.mrf.mxu0  ;;  %v1770_v16 = vld [vmem:[%s2420_s10 + $0x8] sm:$0xff]  }
 0x62c   :  { %1182 = vrot.lane.b32.xlu1 %v1561_v14, %s1975_s17  ;;  %v1093_v20 = vpop.f32.mrf.mxu1  ;;  %v1769_v14 = vld [vmem:[%s2420_s10 + $0x10] sm:$0xff]   ;;  %v1548_v19 = vld [vmem:[#allocation11] ss:$0 sm:$0xff] }
 0x62d   :  { %v1045_v53 = vpop.f32.mrf.mxu0 }
 0x62e   :  { %v1707_v22 = vpop.f32.mrf.mxu1 }
 0x62f   :  { %v1701_v23 = vpop.f32.mrf.mxu0 }
 0x630   :  { %1189 = vrot.lane.b32.xlu1 %v1562_v21, %s1976_s8 }
 0x634   :  { %v1138_v42 = vpop.f32.mrf.mxu0 }
 0x635   :  { %v1563_v41 = vpack.c.bf16 %v1138_v42, %v1138_v42 }
 0x636   :  { %v1712_v38 = vpop.f32.mrf.mxu0 }
 0x637   :  { %1196 = vrot.lane.b32.xlu1 %v1563_v41, %s1977_s28 }
 0x638   :  { %v1141_v18 = vpop.f32.mrf.mxu0 }
 0x63a   :  { %v1713_v24 = vpop.f32.mrf.mxu0 }
 0x661   :  { %v1158_v25 = vpop.permute.xlu0 %1157 }
 0x662   :  { %1161 = vst.msk [vmem:[#allocation2] sm:$0xf] %vm1160_vm6, %v1158_v25 }
 0x665   :  { %v1166_v13 = vpop.permute.xlu0 %1165 }
 0x666   :  { %1169 = vst.msk [vmem:[#allocation2] sm:$0xf] %vm1168_vm7, %v1166_v13 }
 0x696   :  { %v1174_v26 = vpop.permute.xlu0 %1173 }
 0x697   :  { %1177 = vst.msk [vmem:[#allocation2] sm:$0xf] %vm1176_vm8, %v1174_v26 }
 0x69e   :  { %v1183_v27 = vpop.permute.xlu1 %1182 }
 0x69f   :  { %1185 = vst.msk [vmem:[#allocation2 + $0x4] sm:$0xf] %vm1160_vm6, %v1183_v27 }
 0x6a2   :  { %v1190_v30 = vpop.permute.xlu1 %1189 }
 0x6a3   :  { %1192 = vst.msk [vmem:[#allocation2 + $0x4] sm:$0xf] %vm1168_vm7, %v1190_v30 }
 0x6a9   :  { %v1197_v12 = vpop.permute.xlu1 %1196 }
 0x6aa   :  { %1199 = vst.msk [vmem:[#allocation2 + $0x4] sm:$0xf] %vm1176_vm8, %v1197_v12 }
 0x6b1   :  { %v1765_v31 = vld [vmem:[#allocation2] sm:$0xff]  }
 0x6b2   :  { %1719 = vmatmul.mubr.msk.bf16.vlgmr.msra.gmra.mxu1 %vm108_vm0, %v1765_v31 }
 0x6b3   :  { %1738 = vmatprep.mubr.msk.bf16.mxu1 %vm1970_vm1, %v1969_v15  ;;  %1731 = vmatpush3.bf16.msra.mxu1 %v1768_v54 }
 0x6b4   :  { %1732 = vmatprep.subr.bf16.mxu1 %v1969_v15 }
 0x6b7   :  { %1733 = vmatpush3.bf16.msra.mxu1 %v1769_v14 }
 0x6b8   :  { %1734 = vmatprep.subr.bf16.mxu1 %v1969_v15 }
 0x6bb   :  { %1735 = vmatpush3.bf16.msra.mxu1 %v1770_v16 }
 0x6bc   :  { %1736 = vmatprep.subr.bf16.mxu1 %v1969_v15 }
 0x6bf   :  { %1737 = vmatpush3.bf16.msra.mxu1 %v1771_v17 }
 0x772   :  { %v1267_v33 = vpop.f32.mrf.mxu1 }
 0x773   :  { %v1268_v45 = vadd.f32 %v1541_v32, %v1267_v33 }
 0x774   :  { %v1720_v28 = vpop.f32.mrf.mxu1 }
 0x775   :  { %v2365_v34 = vadd.f32 %v1268_v45, %v2071_v0 }
 0x776   :  { %v1270_v29 = vpop.f32.mrf.mxu1 }
 0x777   :  { %v1271_v35 = vadd.f32 %v1541_v32, %v1270_v29  ;;  %v1276_v36 = vsel %vm108_vm0, %v2365_v34, 0.0 }
 0x778   :  { %1277 = vadd.xlane.f32.xlu0 %v1276_v36  ;;  %v1721_v37 = vpop.f32.mrf.mxu1 }
 0x779   :  { %v2370_v39 = vadd.f32 %v1271_v35, %v2076_v1 }
 0x77b   :  { %v1279_v40 = vsel %vm108_vm0, %v2370_v39, 0.0 }
 0x77c   :  { %1280 = vadd.xlane.f32.xlu1 %v1279_v40 }
 0x801   :  { %v1278_v43 = vpop.xlane.xlu0 %1277 }
 0x802   :  { %v1282_v44 = vmul.f32 0.03125, %v1278_v43 }
 0x804   :  { %v1284_v48 = vsub.f32 %v2365_v34, %v1282_v44 }
 0x805   :  { %v1281_v0 = vpop.xlane.xlu1 %1280 }
 0x806   :  { %v1283_v51 = vmul.f32 0.03125, %v1281_v0  ;;  %v1286_v52 = vmul.f32 %v1284_v48, %v1284_v48 }
 0x808   :  { %v1285_v50 = vsub.f32 %v2370_v39, %v1283_v51  ;;  %v1288_v55 = vsel %vm108_vm0, %v1286_v52, 0.0 }
 0x809   :  { %1289 = vadd.xlane.f32.xlu0 %v1288_v55 }
 0x80a   :  { %v1287_v46 = vmul.f32 %v1285_v50, %v1285_v50 }
 0x80c   :  { %v1291_v1 = vsel %vm108_vm0, %v1287_v46, 0.0 }
 0x80d   :  { %1292 = vadd.xlane.f32.xlu0 %v1291_v1 }
 0x892   :  { %v1290_v57 = vpop.xlane.xlu0 %1289 }
 0x893   :  { %v1294_v58 = vmul.f32 0.03125, %v1290_v57 }
 0x895   :  { %v1296_v59 = vadd.f32 1e-05, %v1294_v58 }
 0x896   :  { %v1293_v60 = vpop.xlane.xlu0 %1292 }
 0x897   :  { %1808 = vrsqrt.f32 %v1296_v59  ;;  %v1295_v61 = vmul.f32 0.03125, %v1293_v60 }
 0x899   :  { %v1297_v62 = vadd.f32 1e-05, %v1295_v61 }
 0x89b   :  { %1810 = vrsqrt.f32 %v1297_v62 }
 0x8a4   :  { %v1809_v63 = vpop.eup %1808 }
 0x8a5   :  { %v1300_v2 = vmul.f32 %v1809_v63, %v1284_v48 }
 0x8a7   :  { %v1309_v6 = vmul.f32 %v1546_v3, %v1300_v2 }
 0x8a8   :  { %v1811_v4 = vpop.eup %1810 }
 0x8a9   :  { %v1301_v5 = vmul.f32 %v1811_v4, %v1285_v50  ;;  %v1318_v9 = vadd.f32 %v1547_v7, %v1309_v6 }
 0x8ab   :  { %v1310_v8 = vmul.f32 %v1546_v3, %v1301_v5 }
 0x8ad   :  { %v1319_v10 = vadd.f32 %v1547_v7, %v1310_v8 }
 0x8af   :  { %v1320_v11 = vpack.c.bf16 %v1319_v10, %v1318_v9 }
 0x8b1   :  { %1727 = vmatmul.mubr.msk.bf16.vlgmr.msra.gmra.mxu0 %vm108_vm0, %v1320_v11 }
 0x971   :  { %v1381_v20 = vpop.f32.mrf.mxu0 }
 0x972   :  { %v1382_v53 = vadd.f32 %v1548_v19, %v1381_v20 }
 0x973   :  { %v1728_v49 = vpop.f32.mrf.mxu0 }
 0x974   :  { %v1388_v42 = vmax.f32 %v1382_v53, 0.0 }
 0x975   :  { %v1384_v21 = vpop.f32.mrf.mxu0 }
 0x976   :  { %v1385_v22 = vadd.f32 %v1548_v19, %v1384_v21 }
 0x977   :  { %v1729_v23 = vpop.f32.mrf.mxu0 }
 0x978   :  { %v1389_v41 = vmax.f32 %v1385_v22, 0.0 }
 0x97a   :  { %v1390_v38 = vpack.c.bf16 %v1389_v41, %v1388_v42 }
 0x97c   :  { %1739 = vmatmul.mubr.msk.bf16.vlgmr.msra.gmra.mxu1 %vm1430_vm9, %v1390_v38 }
 0x97d   :  { %1923 = shalt.err (!%p1920_p1)
}
 0x97e   :  { %s1979_s10 = smov 128   ;;  %v1552_v15 = vld [vmem:[%s2421_s11] ss:$0 sm:$0xff]  ;;  %s1980_s26 = smov [#allocation12]  }
 0x97f   :  { %1502 = dma.vmem_to_hbm [thread:$0]  %s1497_s9, 1024, %s2423_s13, [#allocation14], %s1979_s10, %s1979_s10, %s1975_s17  }
 0x980   :  { %s1484_s27 = sshll.u32 %s1980_s26, 4  ;;  %s1485_s27 = int_to_ptr.vmem [resolvable:$true] %s1484_s27 }
 0x981   :  { %s1932_s13 = scalar_lea.vmem %s1485_s27, 256  ;;  %p1937_p3 = scmp.lt.s32.totalorder %s1485_s27, %s1485_s27 }
 0x982   :  { %p1933_p2 = scmp.ne.s32.totalorder %s1485_s27, %s1932_s13  ;;  %p1938_p4 = scmp.lt.s32.totalorder %s1932_s13, %s1932_s13 }
 0x984   :  { %p1939_p5 = por %p1938_p4, %p1937_p3 }
 0x986   :  { %p1940_p6 = pnand %p1939_p5, %p1933_p2 }
 0xa3c   :  { %v1468_v18 = vpop.f32.mrf.mxu1 }
 0xa3d   :  { %v1469_v24 = vadd.f32 %v1552_v15, %v1468_v18 }
 0xa3e   :  { %v1740_v25 = vpop.f32.mrf.mxu1 }
 0xa3f   :  { %v1475_v13 = vadd.f32 %v1469_v24, %v2365_v34 }
 0xa40   :  { %v1471_v26 = vpop.f32.mrf.mxu1 }
 0xa41   :  { %1477 = vst.msk [vmem:[#allocation12] sm:$0xff] %vm108_vm0, %v1475_v13  ;;  %v1472_v27 = vadd.f32 %v1552_v15, %v1471_v26 }
 0xa42   :  { %v1741_v30 = vpop.f32.mrf.mxu1 }
 0xa43   :  { %v1476_v12 = vadd.f32 %v1472_v27, %v2370_v39 }
 0xa45   :  { %1478 = vst.msk [vmem:[#allocation12 + $0x8] sm:$0xff] %vm108_vm0, %v1476_v12 }
 0xa46   :  { %1943 = shalt.err (!%p1940_p6)
}
 0xa47   :  { %1490 = dma.vmem_to_hbm [thread:$0]  %s1485_s27, 256, %s2422_s12, [#allocation5], %s1979_s10, %s1979_s10, %s1975_s17  }
 0xa48   :  { %1958 = dma.done.wait [#allocation5], 256  }
 0xa49   :  { %1959 = vsyncadd [#allocation5], 4294967040 }
 0xa4a   :  { %1960 = dma.done.wait [#allocation14], 1024  }
 0xa4b   :  { %1961 = vsyncadd [#allocation14], 4294966272 }
 0xa4c   :  { %1509 = vsyncpa [#allocation4], 1 }
 0xa4d   :  { %1510 = vsyncpa [#allocation7], 1 }
 0xa4e   :  { %1511 = vsyncpa [#allocation10], 1 }
 0xa4f   :  { %1512 = vsyncpa [#allocation5], 1 }
 0xa50   :  { %1513 = vsyncpa [#allocation14], 1 }

</bundles_post_ra>
